<compile_context>
chip_gen: v5e
topology: v5e:2x2
jax: 0.10.0
libtpu: 0.0.40
codegen_flags: <defaults>
</compile_context>

<pallas_src>
import functools

import jax
import jax.numpy as jnp
from jax import lax
from jax.experimental import pallas as pl
from jax.experimental.pallas import tpu as pltpu

WIN_SIZE = 11
WIN_SIGMA = 1.5
K1 = 0.01
K2 = 0.03
C1 = (K1 * 1.0) ** 2
C2 = (K2 * 1.0) ** 2


def _gaussian_1d(size, sigma):
    coords = jnp.arange(size, dtype=jnp.float32) - size // 2
    g = jnp.exp(-(coords ** 2) / (2.0 * sigma ** 2))
    return g / jnp.sum(g)


def _band_matrix(out_dim, in_dim, g):
    # F[i, j] = g[j - i] if 0 <= j - i < win else 0   (valid conv as matmul)
    row = jnp.arange(out_dim)[:, None]
    col = jnp.arange(in_dim)[None, :]
    off = col - row
    mask = (off >= 0) & (off < g.shape[0])
    return jnp.where(mask, g[jnp.clip(off, 0, g.shape[0] - 1)], 0.0).astype(jnp.float32)


def _pick_batch(nc, h, w, budget_bytes=8 * 1024 * 1024):
    """Largest divisor of nc whose per-step f32 footprint fits a VMEM budget."""
    # Rough per-image f32 footprint inside one grid step:
    #   2 inputs x 2 pipeline buffers + 5-way stacked operand
    #   + 5 half-filtered temporaries + 5 filtered maps + 5 H-filter rows
    #   + ~2 ssim temporaries (each <= h*w).
    per_img = 4 * h * w * (2 * 2 + 5 + 5 + 5 + 5 + 2)
    cap = max(1, budget_bytes // per_img)
    b = 1
    for d in range(1, nc + 1):
        if nc % d == 0 and d <= cap:
            b = d
    return b


def _combined_loss_kernel(r_ref, x_ref, fhb_ref, fwt_ref, out_ref):
    r = r_ref[...].astype(jnp.float32)      # (B, H, W)
    x = x_ref[...].astype(jnp.float32)      # (B, H, W)
    fh_b = fhb_ref[...]                     # (5B, OH, H)  pre-broadcast in wrapper
    fwt = fwt_ref[...]                      # (W, OW)      pre-transposed in wrapper

    b, h, w = r.shape
    ow = fwt.shape[1]

    # --- MSE / L1 partial sums for this block ---
    d = r - x
    sq = jnp.sum(d * d)
    ab = jnp.sum(jnp.abs(d))

    # --- SSIM on [0,1]-rescaled images ---
    img1 = (r + 1.0) * 0.5
    img2 = (x + 1.0) * 0.5

    # Stack the 5 filter inputs for all B images -> one big MXU operand.
    stack = jnp.concatenate(
        [img1, img2, img1 * img1, img2 * img2, img1 * img2], axis=0)  # (5B,H,W)

    # One fused right (W-axis) filter multiply.
    t = jnp.dot(stack.reshape(5 * b * h, w), fwt,
                preferred_element_type=jnp.float32)                   # (5B*H,OW)
    t = t.reshape(5 * b, h, ow)

    # One batched left (H-axis) filter multiply (filter already broadcast).
    f = jnp.einsum('boh,bhw->bow', fh_b, t,
                   preferred_element_type=jnp.float32)                # (5B,OH,OW)

    mu1 = f[0 * b:1 * b]
    mu2 = f[1 * b:2 * b]
    e11 = f[2 * b:3 * b]
    e22 = f[3 * b:4 * b]
    e12 = f[4 * b:5 * b]

    mu1_sq = mu1 * mu1
    mu2_sq = mu2 * mu2
    mu1_mu2 = mu1 * mu2
    sigma1_sq = e11 - mu1_sq
    sigma2_sq = e22 - mu2_sq
    sigma12 = e12 - mu1_mu2

    ssim_map = ((2.0 * mu1_mu2 + C1) * (2.0 * sigma12 + C2)) / (
        (mu1_sq + mu2_sq + C1) * (sigma1_sq + sigma2_sq + C2))
    ss = jnp.sum(ssim_map)

    # Single lane-dense (8,128) per-block partial tile: unmasked store, no RMW,
    # grid axis stays "parallel".  row0 = sum(d^2), row1 = sum|d|, row2 = sum ssim.
    row = lax.broadcasted_iota(jnp.int32, (8, 128), 0)
    tile = jnp.where(row == 0, sq,
                     jnp.where(row == 1, ab,
                               jnp.where(row == 2, ss, 0.0)))
    out_ref[0] = tile.astype(jnp.float32)


@functools.partial(jax.jit, static_argnames=("alpha", "beta", "gamma"))
def combined_loss(recon, x, alpha=0.5, beta=0.3, gamma=0.2):
    N, C, H, W = x.shape
    OH = H - WIN_SIZE + 1
    OW = W - WIN_SIZE + 1
    assert OH > 0 and OW > 0, "spatial dims must exceed SSIM window (11)"

    g = _gaussian_1d(WIN_SIZE, WIN_SIGMA)
    fh = _band_matrix(OH, H, g)              # (OH, H)
    fwt = _band_matrix(OW, W, g).T           # (W, OW), pre-transposed for kernel

    nc = N * C
    B = _pick_batch(nc, H, W)
    G = nc // B

    # Keep native dtype; the kernel casts to f32 after the DMA.
    r2 = recon.reshape(nc, H, W)
    x2 = x.reshape(nc, H, W)

    # Pre-broadcast the H-axis filter for the batched in-kernel matmul; the
    # block index is constant across the grid so it is DMA'd into VMEM once
    # and the kernel never rebuilds a (5B, OH, H) broadcast per step.
    fh_b = jnp.broadcast_to(fh[None], (5 * B, OH, H))

    parts = pl.pallas_call(
        _combined_loss_kernel,
        out_shape=jax.ShapeDtypeStruct((G, 8, 128), jnp.float32),
        grid_spec=pltpu.PrefetchScalarGridSpec(
            num_scalar_prefetch=0,
            grid=(G,),
            in_specs=[
                pl.BlockSpec((B, H, W), lambda i: (i, 0, 0)),
                pl.BlockSpec((B, H, W), lambda i: (i, 0, 0)),
                pl.BlockSpec((5 * B, OH, H), lambda i: (0, 0, 0)),
                pl.BlockSpec((W, OW), lambda i: (0, 0)),
            ],
            out_specs=pl.BlockSpec((1, 8, 128), lambda i: (i, 0, 0)),
        ),
        compiler_params=pltpu.CompilerParams(
            dimension_semantics=("parallel",),
            vmem_limit_bytes=32 * 1024 * 1024),
    )(r2, x2, fh_b, fwt)

    # Reduce per-block partial sums in the wrapper (no long-lived running
    # accumulator across blocks inside the kernel).
    sumsq = jnp.sum(parts[:, 0, 0])
    sumabs = jnp.sum(parts[:, 1, 0])
    sumssim = jnp.sum(parts[:, 2, 0])

    n_el = N * C * H * W
    loss_mse = sumsq / n_el
    loss_l1 = sumabs / n_el
    ssim_val = sumssim / (N * C * OH * OW)
    loss_ssim = 1.0 - ssim_val
    return alpha * loss_mse + beta * loss_l1 + gamma * loss_ssim


def _combined_loss_ref(recon, x, alpha=0.5, beta=0.3, gamma=0.2):
    """Pure-JAX reference (same math, no Pallas) for a correctness check."""
    N, C, H, W = x.shape
    OH = H - WIN_SIZE + 1
    OW = W - WIN_SIZE + 1
    g = _gaussian_1d(WIN_SIZE, WIN_SIGMA)
    fh = _band_matrix(OH, H, g)
    fw = _band_matrix(OW, W, g)

    recon = recon.astype(jnp.float32)
    x = x.astype(jnp.float32)
    loss_mse = jnp.mean((recon - x) ** 2)
    loss_l1 = jnp.mean(jnp.abs(recon - x))

    img1 = (recon + 1.0) * 0.5
    img2 = (x + 1.0) * 0.5

    def gfilt(img):
        return jnp.einsum("ij,ncjk,lk->ncil", fh, img, fw)

    mu1, mu2 = gfilt(img1), gfilt(img2)
    s1 = gfilt(img1 * img1) - mu1 * mu1
    s2 = gfilt(img2 * img2) - mu2 * mu2
    s12 = gfilt(img1 * img2) - mu1 * mu2
    ssim_map = ((2 * mu1 * mu2 + C1) * (2 * s12 + C2)) / (
        (mu1 * mu1 + mu2 * mu2 + C1) * (s1 + s2 + C2))
    ssim_val = jnp.mean(ssim_map)
    return alpha * loss_mse + beta * loss_l1 + gamma * (1.0 - ssim_val)


if __name__ == "__main__":
    key = jax.random.PRNGKey(0)
    k1, k2 = jax.random.split(key)
    N, C, H, W = 2, 4, 16, 16
    # Images are expected in [-1, 1] (tanh-style autoencoder output).
    x = jnp.tanh(jax.random.normal(k1, (N, C, H, W), dtype=jnp.float32))
    recon = jnp.tanh(jax.random.normal(k2, (N, C, H, W), dtype=jnp.float32))

    loss = combined_loss(recon, x)
    loss = jax.block_until_ready(loss)

    loss_ref = _combined_loss_ref(recon, x)
    assert jnp.allclose(loss, loss_ref, rtol=1e-4, atol=1e-5), (loss, loss_ref)

    print("KERNEL_OK")
</pallas_src>

<mosaic_0001>
module attributes {stable_mosaic.version = 11 : i64} {
  func.func @_combined_loss_kernel(%arg0: i32, %arg1: memref<8x16x16xf32, #tpu.memory_space<vmem>>, %arg2: memref<8x16x16xf32, #tpu.memory_space<vmem>>, %arg3: memref<40x6x16xf32, #tpu.memory_space<vmem>>, %arg4: memref<16x6xf32, #tpu.memory_space<vmem>>, %arg5: memref<1x8x128xf32, #tpu.memory_space<vmem>>) attributes {dimension_semantics = [#tpu.dimension_semantics<parallel>], iteration_bounds = array<i64: 1>, scalar_prefetch = 0 : i64, scratch_operands = 0 : i64, tpu.core_type = #tpu.core_type<tc>, window_params = [{transform_indices = @transform_0, window_bounds = array<i64: 8, 16, 16>}, {transform_indices = @transform_1, window_bounds = array<i64: 8, 16, 16>}, {pipeline_mode = #tpu.pipeline_mode<synchronous>, transform_indices = @transform_2, window_bounds = array<i64: 40, 6, 16>}, {pipeline_mode = #tpu.pipeline_mode<synchronous>, transform_indices = @transform_3, window_bounds = array<i64: 16, 6>}, {transform_indices = @transform_4, window_bounds = array<i64: 1, 8, 128>}]} {
    %c0 = arith.constant 0 : index
    %c0_0 = arith.constant 0 : index
    %c0_1 = arith.constant 0 : index
    %0 = vector.load %arg1[%c0, %c0_0, %c0_1] : memref<8x16x16xf32, #tpu.memory_space<vmem>>, vector<8x16x16xf32>
    %c0_2 = arith.constant 0 : index
    %c0_3 = arith.constant 0 : index
    %c0_4 = arith.constant 0 : index
    %1 = vector.load %arg2[%c0_2, %c0_3, %c0_4] : memref<8x16x16xf32, #tpu.memory_space<vmem>>, vector<8x16x16xf32>
    %c0_5 = arith.constant 0 : index
    %c0_6 = arith.constant 0 : index
    %c0_7 = arith.constant 0 : index
    %2 = vector.load %arg3[%c0_5, %c0_6, %c0_7] : memref<40x6x16xf32, #tpu.memory_space<vmem>>, vector<40x6x16xf32>
    %c0_8 = arith.constant 0 : index
    %c0_9 = arith.constant 0 : index
    %3 = vector.load %arg4[%c0_8, %c0_9] : memref<16x6xf32, #tpu.memory_space<vmem>>, vector<16x6xf32>
    %4 = arith.subf %0, %1 : vector<8x16x16xf32>
    %5 = arith.mulf %4, %4 : vector<8x16x16xf32>
    %6 = vector.shape_cast %5 : vector<8x16x16xf32> to vector<1x8x16x16xf32>
    %cst = arith.constant dense<0.000000e+00> : vector<1xf32>
    %7 = vector.multi_reduction <add>, %6, %cst [1, 2, 3] : vector<1x8x16x16xf32> to vector<1xf32>
    %8 = vector.shape_cast %7 : vector<1xf32> to vector<1x1x1x1xf32>
    %9 = vector.extract %8[0, 0, 0, 0] : f32 from vector<1x1x1x1xf32>
    %10 = math.absf %4 : vector<8x16x16xf32>
    %11 = vector.shape_cast %10 : vector<8x16x16xf32> to vector<1x8x16x16xf32>
    %cst_10 = arith.constant dense<0.000000e+00> : vector<1xf32>
    %12 = vector.multi_reduction <add>, %11, %cst_10 [1, 2, 3] : vector<1x8x16x16xf32> to vector<1xf32>
    %13 = vector.shape_cast %12 : vector<1xf32> to vector<1x1x1x1xf32>
    %14 = vector.extract %13[0, 0, 0, 0] : f32 from vector<1x1x1x1xf32>
    %cst_11 = arith.constant 1.000000e+00 : f32
    %15 = vector.broadcast %cst_11 : f32 to vector<8x16x16xf32>
    %16 = arith.addf %0, %15 : vector<8x16x16xf32>
    %cst_12 = arith.constant 5.000000e-01 : f32
    %17 = vector.broadcast %cst_12 : f32 to vector<8x16x16xf32>
    %18 = arith.mulf %16, %17 : vector<8x16x16xf32>
    %cst_13 = arith.constant 1.000000e+00 : f32
    %19 = vector.broadcast %cst_13 : f32 to vector<8x16x16xf32>
    %20 = arith.addf %1, %19 : vector<8x16x16xf32>
    %cst_14 = arith.constant 5.000000e-01 : f32
    %21 = vector.broadcast %cst_14 : f32 to vector<8x16x16xf32>
    %22 = arith.mulf %20, %21 : vector<8x16x16xf32>
    %23 = arith.mulf %18, %18 : vector<8x16x16xf32>
    %24 = arith.mulf %22, %22 : vector<8x16x16xf32>
    %25 = arith.mulf %18, %22 : vector<8x16x16xf32>
    %26 = tpu.concatenate %18, %22, %23, %24, %25 in 0 : vector<8x16x16xf32>, vector<8x16x16xf32>, vector<8x16x16xf32>, vector<8x16x16xf32>, vector<8x16x16xf32> -> vector<40x16x16xf32>
    %27 = vector.shape_cast %26 : vector<40x16x16xf32> to vector<640x16xf32>
    %cst_15 = arith.constant dense<0.000000e+00> : vector<640x6xf32>
    %28 = tpu.matmul %27, %3, %cst_15 {dimension_numbers = #tpu.dot_dimension_numbers<[1], [0], [0], [1], [0, 0, 1, 1], [], []>} : vector<640x16xf32>, vector<16x6xf32>, vector<640x6xf32> -> vector<640x6xf32>
    %29 = vector.shape_cast %28 : vector<640x6xf32> to vector<40x16x6xf32>
    "tpu.trace_start"() <{level = 10 : i32, message = "boh,bhw->bow"}> : () -> ()
    %cst_16 = arith.constant dense<0.000000e+00> : vector<40x6x6xf32>
    %30 = tpu.matmul %2, %29, %cst_16 {dimension_numbers = #tpu.dot_dimension_numbers<[2], [1], [1], [2], [0, 0, 0, 1, 1, 2], [0], [0]>} : vector<40x6x16xf32>, vector<40x16x6xf32>, vector<40x6x6xf32> -> vector<40x6x6xf32>
    "tpu.trace_stop"() : () -> ()
    %31 = vector.extract_strided_slice %30 {offsets = [0, 0, 0], sizes = [8, 6, 6], strides = [1, 1, 1]} : vector<40x6x6xf32> to vector<8x6x6xf32>
    %32 = vector.extract_strided_slice %30 {offsets = [8, 0, 0], sizes = [8, 6, 6], strides = [1, 1, 1]} : vector<40x6x6xf32> to vector<8x6x6xf32>
    %33 = vector.extract_strided_slice %30 {offsets = [16, 0, 0], sizes = [8, 6, 6], strides = [1, 1, 1]} : vector<40x6x6xf32> to vector<8x6x6xf32>
    %34 = vector.extract_strided_slice %30 {offsets = [24, 0, 0], sizes = [8, 6, 6], strides = [1, 1, 1]} : vector<40x6x6xf32> to vector<8x6x6xf32>
    %35 = vector.extract_strided_slice %30 {offsets = [32, 0, 0], sizes = [8, 6, 6], strides = [1, 1, 1]} : vector<40x6x6xf32> to vector<8x6x6xf32>
    %36 = arith.mulf %31, %31 : vector<8x6x6xf32>
    %37 = arith.mulf %32, %32 : vector<8x6x6xf32>
    %38 = arith.mulf %31, %32 : vector<8x6x6xf32>
    %39 = arith.subf %33, %36 : vector<8x6x6xf32>
    %40 = arith.subf %34, %37 : vector<8x6x6xf32>
    %41 = arith.subf %35, %38 : vector<8x6x6xf32>
    %cst_17 = arith.constant 2.000000e+00 : f32
    %42 = vector.broadcast %cst_17 : f32 to vector<8x6x6xf32>
    %43 = arith.mulf %42, %38 : vector<8x6x6xf32>
    %cst_18 = arith.constant 9.99999974E-5 : f32
    %44 = vector.broadcast %cst_18 : f32 to vector<8x6x6xf32>
    %45 = arith.addf %43, %44 : vector<8x6x6xf32>
    %cst_19 = arith.constant 2.000000e+00 : f32
    %46 = vector.broadcast %cst_19 : f32 to vector<8x6x6xf32>
    %47 = arith.mulf %46, %41 : vector<8x6x6xf32>
    %cst_20 = arith.constant 8.99999984E-4 : f32
    %48 = vector.broadcast %cst_20 : f32 to vector<8x6x6xf32>
    %49 = arith.addf %47, %48 : vector<8x6x6xf32>
    %50 = arith.mulf %45, %49 : vector<8x6x6xf32>
    %51 = arith.addf %36, %37 : vector<8x6x6xf32>
    %cst_21 = arith.constant 9.99999974E-5 : f32
    %52 = vector.broadcast %cst_21 : f32 to vector<8x6x6xf32>
    %53 = arith.addf %51, %52 : vector<8x6x6xf32>
    %54 = arith.addf %39, %40 : vector<8x6x6xf32>
    %cst_22 = arith.constant 8.99999984E-4 : f32
    %55 = vector.broadcast %cst_22 : f32 to vector<8x6x6xf32>
    %56 = arith.addf %54, %55 : vector<8x6x6xf32>
    %57 = arith.mulf %53, %56 : vector<8x6x6xf32>
    %58 = arith.divf %50, %57 : vector<8x6x6xf32>
    %59 = vector.shape_cast %58 : vector<8x6x6xf32> to vector<1x8x6x6xf32>
    %cst_23 = arith.constant dense<0.000000e+00> : vector<1xf32>
    %60 = vector.multi_reduction <add>, %59, %cst_23 [1, 2, 3] : vector<1x8x6x6xf32> to vector<1xf32>
    %61 = vector.shape_cast %60 : vector<1xf32> to vector<1x1x1x1xf32>
    %62 = vector.extract %61[0, 0, 0, 0] : f32 from vector<1x1x1x1xf32>
    %63 = tpu.iota {dimensions = array<i32: 0>} : vector<8x128xi32>
    %c0_i32 = arith.constant 0 : i32
    %64 = vector.broadcast %c0_i32 : i32 to vector<8x128xi32>
    %65 = arith.cmpi eq, %63, %64 : vector<8x128xi32>
    %c1_i32 = arith.constant 1 : i32
    %66 = vector.broadcast %c1_i32 : i32 to vector<8x128xi32>
    %67 = arith.cmpi eq, %63, %66 : vector<8x128xi32>
    %c2_i32 = arith.constant 2 : i32
    %68 = vector.broadcast %c2_i32 : i32 to vector<8x128xi32>
    %69 = arith.cmpi eq, %63, %68 : vector<8x128xi32>
    %cst_24 = arith.constant 0.000000e+00 : f32
    %70 = vector.broadcast %62 : f32 to vector<8x128xf32>
    %71 = vector.broadcast %cst_24 : f32 to vector<8x128xf32>
    %72 = arith.select %69, %70, %71 : vector<8x128xi1>, vector<8x128xf32>
    %73 = vector.broadcast %14 : f32 to vector<8x128xf32>
    %74 = arith.select %67, %73, %72 : vector<8x128xi1>, vector<8x128xf32>
    %75 = vector.broadcast %9 : f32 to vector<8x128xf32>
    %76 = arith.select %65, %75, %74 : vector<8x128xi1>, vector<8x128xf32>
    %c0_25 = arith.constant 0 : index
    %c0_26 = arith.constant 0 : index
    %c0_27 = arith.constant 0 : index
    %77 = vector.load %arg5[%c0_25, %c0_26, %c0_27] : memref<1x8x128xf32, #tpu.memory_space<vmem>>, vector<1x8x128xf32>
    %78 = vector.shape_cast %77 : vector<1x8x128xf32> to vector<8x128xf32>
    %79 = vector.shape_cast %76 : vector<8x128xf32> to vector<1x8x128xf32>
    tpu.vector_store %arg5[%c0_25, %c0_26, %c0_27], %79 {strides = array<i32>} : memref<1x8x128xf32, #tpu.memory_space<vmem>>, vector<1x8x128xf32>,
    return
  }
  func.func @transform_0(%arg0: i32) -> (i32, i32, i32) {
    %c0_i32 = arith.constant 0 : i32
    %c0_i32_0 = arith.constant 0 : i32
    %c0_i32_1 = arith.constant 0 : i32
    return %arg0, %c0_i32, %c0_i32_0 : i32, i32, i32
  }
  func.func @transform_1(%arg0: i32) -> (i32, i32, i32) {
    %c0_i32 = arith.constant 0 : i32
    %c0_i32_0 = arith.constant 0 : i32
    %c0_i32_1 = arith.constant 0 : i32
    return %arg0, %c0_i32, %c0_i32_0 : i32, i32, i32
  }
  func.func @transform_2(%arg0: i32) -> (i32, i32, i32) {
    %c0_i32 = arith.constant 0 : i32
    %c0_i32_0 = arith.constant 0 : i32
    %c0_i32_1 = arith.constant 0 : i32
    %c0_i32_2 = arith.constant 0 : i32
    return %c0_i32, %c0_i32_0, %c0_i32_1 : i32, i32, i32
  }
  func.func @transform_3(%arg0: i32) -> (i32, i32) {
    %c0_i32 = arith.constant 0 : i32
    %c0_i32_0 = arith.constant 0 : i32
    %c0_i32_1 = arith.constant 0 : i32
    return %c0_i32, %c0_i32_0 : i32, i32
  }
  func.func @transform_4(%arg0: i32) -> (i32, i32, i32) {
    %c0_i32 = arith.constant 0 : i32
    %c0_i32_0 = arith.constant 0 : i32
    %c0_i32_1 = arith.constant 0 : i32
    return %arg0, %c0_i32, %c0_i32_0 : i32, i32, i32
  }
}

</mosaic_0001>

<bundles_post_ra>
// kernel: combined_loss.1
= control target key start
LH: loop header
LB: loop body
LE: loop exit
PB: predicated region body
PF: predicated region fallthrough
CT: control target
= control target key end

     0   :  { %vm123_vm0 = vcmask 130048   ;;  %vm1997_vm14 = vcmask 46080   ;;  %s3213_s3 = inlined_call_operand.vmem [shape: f32[16,6], index: 3, kind: input, shape index: {}]   ;;  %s3214_s0 = inlined_call_operand.vmem [shape: f32[8,16,16], index: 0, kind: input, shape index: {}]   ;;  %s3215_s1 = inlined_call_operand.vmem [shape: f32[8,16,16], index: 1, kind: input, shape index: {}]   ;;  %s3216_s2 = inlined_call_operand.vmem [shape: f32[40,6,16], index: 2, kind: input, shape index: {}]   ;;  %s3217_s4 = inlined_call_operand.vmem [shape: f32[1,8,128], index: 4, kind: output, shape index: {}]  }
   0x1   :  { %v90_v0 = vld [vmem:[%s3213_s3 + $0x8] sm:$0xff]  ;;  %v89_v1 = vld [vmem:[%s3213_s3] sm:$0xff]  ;;  %v19_v9 = vld [vmem:[%s3214_s0 + $0x10] sm:$0xff] }
   0x2   :  { %v17_v2 = vld [vmem:[%s3214_s0] sm:$0xff]  ;;  %586 = vmatpush.msra.mxu0 %v90_v0  ;;  %v18_v5 = vld [vmem:[%s3214_s0 + $0x8] sm:$0xff]  ;;  %2158 = vmatpush.msra.mxu1 %v90_v0  ;;  %v2243_v10 = vld [vmem:[%s3215_s1 + $0x10] sm:$0xff]  ;;  %v222_v44 = vadd.f32 1.0, %v19_v9 }
   0x3   :  { %v2225_v3 = vld [vmem:[%s3215_s1] sm:$0xff]  ;;  %v220_v4 = vadd.f32 1.0, %v17_v2  ;;  %v2233_v6 = vld [vmem:[%s3215_s1 + $0x8] sm:$0xff]  ;;  %2159 = vmatpush.msra.mxu2 %v90_v0  ;;  %2160 = vmatpush.msra.mxu3 %v90_v0  ;;  %v93_v12 = vsub.f32 %v19_v9, %v2243_v10  ;;  %v221_v17 = vadd.f32 1.0, %v18_v5  ;;  %v20_v28 = vld [vmem:[%s3214_s0 + $0x18] sm:$0xff] }
   0x4   :  { %v91_v7 = vsub.f32 %v17_v2, %v2225_v3  ;;  %v92_v8 = vsub.f32 %v18_v5, %v2233_v6  ;;  %587 = vmatpush.msra.mxu0 %v89_v1  ;;  %2161 = vmatpush.msra.mxu1 %v89_v1  ;;  %v2262_v29 = vld [vmem:[%s3215_s1 + $0x18] sm:$0xff]  ;;  %v21_v31 = vld [vmem:[%s3214_s0 + $0x20] sm:$0xff]  ;;  %v22_v39 = vld [vmem:[%s3214_s0 + $0x28] sm:$0xff]  ;;  %v2302_v62 = vmul.f32 0.5, %v222_v44 }
   0x5   :  { %v2245_v11 = vmul.f32 0.5, %v220_v4  ;;  %2162 = vmatpush.msra.mxu2 %v89_v1  ;;  %2163 = vmatpush.msra.mxu3 %v89_v1  ;;  %v109_v18 = vmul.f32 %v93_v12, %v93_v12  ;;  %v166_v19 = vand.u32 2147483647, %v93_v12  ;;  %v94_v30 = vsub.f32 %v20_v28, %v2262_v29  ;;  %v2271_v32 = vld [vmem:[%s3215_s1 + $0x20] sm:$0xff]  ;;  %v2282_v40 = vld [vmem:[%s3215_s1 + $0x28] sm:$0xff]  ;;  %v23_v51 = vld [vmem:[%s3214_s0 + $0x30] sm:$0xff] }
   0x6   :  { %v107_v13 = vmul.f32 %v91_v7, %v91_v7  ;;  %v164_v14 = vand.u32 2147483647, %v91_v7  ;;  %v108_v15 = vmul.f32 %v92_v8, %v92_v8  ;;  %v165_v16 = vand.u32 2147483647, %v92_v8  ;;  %v2297_v52 = vld [vmem:[%s3215_s1 + $0x30] sm:$0xff]  ;;  %v24_v8 = vld [vmem:[%s3214_s0 + $0x38] sm:$0xff] }
   0x7   :  { %2038 = vmatmul.msk.f32.vlgmr.msra.gmra.mxu0 %vm123_vm0, %v2245_v11  ;;  %v127_v26 = vsel %vm123_vm0, %v109_v18, 0.0  ;;  %v183_v27 = vsel %vm123_vm0, %v166_v19, 0.0  ;;  %v2273_v33 = vmul.f32 0.5, %v221_v17  ;;  %v95_v36 = vsub.f32 %v21_v31, %v2271_v32  ;;  %v2314_v9 = vld [vmem:[%s3215_s1 + $0x38] sm:$0xff] }
   0x8   :  { %v124_v20 = vsel %vm123_vm0, %v107_v13, 0.0  ;;  %v180_v21 = vsel %vm123_vm0, %v164_v14, 0.0  ;;  %v125_v22 = vsel %vm123_vm0, %v108_v15, 0.0  ;;  %v181_v23 = vsel %vm123_vm0, %v165_v16, 0.0 }
   0x9   :  { %v126_v24 = vadd.f32 %v125_v22, %v124_v20  ;;  %v182_v25 = vadd.f32 %v181_v23, %v180_v21  ;;  %v110_v37 = vmul.f32 %v94_v30, %v94_v30  ;;  %v167_v38 = vand.u32 2147483647, %v94_v30  ;;  %v25_v21 = vld [vmem:[%s3214_s0 + $0x40] sm:$0xff] }
   0xa   :  { %v111_v41 = vmul.f32 %v95_v36, %v95_v36  ;;  %v168_v42 = vand.u32 2147483647, %v95_v36  ;;  %v96_v43 = vsub.f32 %v22_v39, %v2282_v40  ;;  %v97_v55 = vsub.f32 %v23_v51, %v2297_v52  ;;  %v2329_v22 = vld [vmem:[%s3215_s1 + $0x40] sm:$0xff]  ;;  %v2344_v36 = vld [vmem:[%s3215_s1 + $0x48] sm:$0xff] }
   0xb   :  { %v128_v34 = vadd.f32 %v127_v26, %v126_v24  ;;  %v184_v35 = vadd.f32 %v183_v27, %v182_v25  ;;  %v129_v45 = vsel %vm123_vm0, %v110_v37, 0.0  ;;  %v185_v46 = vsel %vm123_vm0, %v167_v38, 0.0 }
   0xc   :  { %v131_v49 = vsel %vm123_vm0, %v111_v41, 0.0  ;;  %v187_v50 = vsel %vm123_vm0, %v168_v42, 0.0  ;;  %v112_v53 = vmul.f32 %v96_v43, %v96_v43  ;;  %v169_v54 = vand.u32 2147483647, %v96_v43 }
   0xd   :  { %v130_v47 = vadd.f32 %v129_v45, %v128_v34  ;;  %v186_v48 = vadd.f32 %v185_v46, %v184_v35  ;;  %v113_v60 = vmul.f32 %v97_v55, %v97_v55  ;;  %v170_v61 = vand.u32 2147483647, %v97_v55  ;;  %v26_v35 = vld [vmem:[%s3214_s0 + $0x48] sm:$0xff] }
   0xe   :  { %v133_v58 = vsel %vm123_vm0, %v112_v53, 0.0  ;;  %v189_v59 = vsel %vm123_vm0, %v169_v54, 0.0  ;;  %v223_v7 = vadd.f32 1.0, %v20_v28  ;;  %v98_v12 = vsub.f32 %v24_v8, %v2314_v9  ;;  %v2378_v54 = vld [vmem:[%s3215_s1 + $0x58] sm:$0xff] }
   0xf   :  { %2039 = vmatmul.msk.f32.gmra.mxu0 %vm123_vm0, %v2273_v33  ;;  %v132_v56 = vadd.f32 %v131_v49, %v130_v47  ;;  %v188_v57 = vadd.f32 %v187_v50, %v186_v48  ;;  %v135_v1 = vsel %vm123_vm0, %v113_v60, 0.0  ;;  %v191_v2 = vsel %vm123_vm0, %v170_v61, 0.0  ;;  %v27_v47 = vld [vmem:[%s3214_s0 + $0x50] sm:$0xff] }
  0x10   :  { %v114_v13 = vmul.f32 %v98_v12, %v98_v12  ;;  %v171_v14 = vand.u32 2147483647, %v98_v12  ;;  %v2317_v15 = vmul.f32 0.5, %v223_v7  ;;  %v224_v20 = vadd.f32 1.0, %v21_v31  ;;  %v2363_v48 = vld [vmem:[%s3215_s1 + $0x50] sm:$0xff]  ;;  %v2416_v7 = vld [vmem:[%s3215_s1 + $0x68] sm:$0xff] }
  0x11   :  { %v134_v63 = vadd.f32 %v133_v58, %v132_v56  ;;  %v190_v0 = vadd.f32 %v189_v59, %v188_v57  ;;  %v99_v23 = vsub.f32 %v25_v21, %v2329_v22  ;;  %v225_v34 = vadd.f32 1.0, %v22_v39  ;;  %v29_v58 = vld [vmem:[%s3214_s0 + $0x60] sm:$0xff] }
  0x12   :  { %v137_v16 = vsel %vm123_vm0, %v114_v13, 0.0  ;;  %v193_v17 = vsel %vm123_vm0, %v171_v14, 0.0  ;;  %v2332_v26 = vmul.f32 0.5, %v224_v20  ;;  %v100_v37 = vsub.f32 %v26_v35, %v2344_v36  ;;  %v2393_v59 = vld [vmem:[%s3215_s1 + $0x60] sm:$0xff] }
  0x13   :  { %v136_v4 = vadd.f32 %v135_v1, %v134_v63  ;;  %v192_v5 = vadd.f32 %v191_v2, %v190_v0  ;;  %v115_v24 = vmul.f32 %v99_v23, %v99_v23  ;;  %v172_v25 = vand.u32 2147483647, %v99_v23  ;;  %v31_v0 = vld [vmem:[%s3214_s0 + $0x70] sm:$0xff] }
  0x14   :  { %v116_v38 = vmul.f32 %v100_v37, %v100_v37  ;;  %v173_v41 = vand.u32 2147483647, %v100_v37  ;;  %v2347_v42 = vmul.f32 0.5, %v225_v34  ;;  %v226_v46 = vadd.f32 1.0, %v23_v51  ;;  %v28_v51 = vld [vmem:[%s3214_s0 + $0x58] sm:$0xff]  ;;  %v47_v1 = vld [vmem:[%s3215_s1 + $0x70] sm:$0xff] }
  0x15   :  { %v138_v18 = vadd.f32 %v137_v16, %v136_v4  ;;  %v194_v19 = vadd.f32 %v193_v17, %v192_v5  ;;  %v139_v27 = vsel %vm123_vm0, %v115_v24, 0.0  ;;  %v195_v28 = vsel %vm123_vm0, %v172_v25, 0.0  ;;  %v30_v5 = vld [vmem:[%s3214_s0 + $0x68] sm:$0xff]  ;;  %v48_v17 = vld [vmem:[%s3215_s1 + $0x78] sm:$0xff] }
  0x16   :  { %v141_v43 = vsel %vm123_vm0, %v116_v38, 0.0  ;;  %v197_v44 = vsel %vm123_vm0, %v173_v41, 0.0  ;;  %v2366_v49 = vsub.f32 %v27_v47, %v2363_v48  ;;  %v2368_v50 = vmul.f32 0.5, %v226_v46  ;;  %v32_v24 = vld [vmem:[%s3214_s0 + $0x78] sm:$0xff] }
  0x17   :  { %2040 = vmatmul.msk.f32.gmra.mxu0 %vm123_vm0, %v2302_v62  ;;  %v140_v30 = vadd.f32 %v139_v27, %v138_v18  ;;  %v196_v31 = vadd.f32 %v195_v28, %v194_v19  ;;  %v227_v53 = vadd.f32 1.0, %v24_v8  ;;  %v2381_v55 = vsub.f32 %v28_v51, %v2378_v54 }
  0x18   :  { %v228_v57 = vadd.f32 1.0, %v25_v21  ;;  %v2396_v60 = vsub.f32 %v29_v58, %v2393_v59  ;;  %v229_v63 = vadd.f32 1.0, %v26_v35  ;;  %v2408_v2 = vsub.f32 %v31_v0, %v47_v1 }
  0x19   :  { %v2351_v39 = vadd.f32 %v141_v43, %v140_v30  ;;  %v2353_v45 = vadd.f32 %v197_v44, %v196_v31  ;;  %v2383_v56 = vmul.f32 0.5, %v227_v53  ;;  %v266_v4 = vadd.f32 1.0, %v47_v1 }
  0x1a   :  { %v2398_v61 = vmul.f32 0.5, %v228_v57  ;;  %v2419_v8 = vsub.f32 %v30_v5, %v2416_v7  ;;  %v2423_v13 = vmul.f32 0.5, %v229_v63  ;;  %v234_v14 = vadd.f32 1.0, %v31_v0 }
  0x1b   :  { %v2421_v12 = vmul.f32 0.5, %v266_v4  ;;  %v230_v16 = vadd.f32 1.0, %v27_v47  ;;  %v267_v19 = vadd.f32 1.0, %v48_v17  ;;  %v231_v25 = vadd.f32 1.0, %v28_v51 }
  0x1c   :  { %v2432_v18 = vmul.f32 0.5, %v234_v14  ;;  %v235_v27 = vadd.f32 1.0, %v32_v24  ;;  %v284_v28 = vmul.f32 %v2245_v11, %v2245_v11  ;;  %v252_v35 = vadd.f32 1.0, %v2225_v3 }
  0x1d   :  { %2068 = vmatmul.msk.f32.vlgmr.msra.gmra.mxu1 %vm123_vm0, %v2421_v12  ;;  %v2436_v21 = vmul.f32 0.5, %v267_v19  ;;  %v2438_v23 = vmul.f32 0.5, %v230_v16  ;;  %v2452_v31 = vmul.f32 0.5, %v231_v25  ;;  %v232_v37 = vadd.f32 1.0, %v29_v58 }
  0x1e   :  { %v298_v20 = vmul.f32 %v2432_v18, %v2432_v18  ;;  %v2450_v30 = vmul.f32 0.5, %v235_v27  ;;  %v268_v38 = vmul.f32 0.5, %v252_v35  ;;  %v285_v43 = vmul.f32 %v2273_v33, %v2273_v33 }
  0x1f   :  { %2041 = vmatmul.msk.f32.gmra.mxu0 %vm123_vm0, %v2317_v15  ;;  %v2461_v41 = vmul.f32 0.5, %v232_v37  ;;  %v315_v46 = vmul.f32 %v2436_v21, %v2436_v21  ;;  %v253_v47 = vadd.f32 1.0, %v2233_v6  ;;  %v233_v3 = vadd.f32 1.0, %v30_v5 }
  0x20   :  { %2084 = vmatmul.msk.f32.vlgmr.msra.gmra.mxu2 %vm123_vm0, %v298_v20  ;;  %v299_v34 = vmul.f32 %v2450_v30, %v2450_v30  ;;  %v300_v44 = vmul.f32 %v268_v38, %v268_v38  ;;  %v286_v57 = vmul.f32 %v2302_v62, %v2302_v62  ;;  %v316_v63 = vmul.f32 %v268_v38, %v2245_v11 }
  0x21   :  { %2101 = vmatmul.msk.f32.vlgmr.msra.gmra.mxu3 %vm123_vm0, %v315_v46  ;;  %v269_v53 = vmul.f32 0.5, %v253_v47  ;;  %v2473_v51 = vmul.f32 0.5, %v233_v3  ;;  %v254_v6 = vadd.f32 1.0, %v2243_v10  ;;  %v287_v1 = vmul.f32 %v2317_v15, %v2317_v15 }
  0x22   :  { %v255_v11 = vadd.f32 1.0, %v2262_v29  ;;  %v288_v14 = vmul.f32 %v2332_v26, %v2332_v26  ;;  %v289_v19 = vmul.f32 %v2347_v42, %v2347_v42  ;;  %v290_v27 = vmul.f32 %v2368_v50, %v2368_v50 }
  0x23   :  { %v301_v58 = vmul.f32 %v269_v53, %v269_v53  ;;  %v270_v0 = vmul.f32 0.5, %v254_v6  ;;  %v317_v5 = vmul.f32 %v269_v53, %v2273_v33  ;;  %v256_v33 = vadd.f32 1.0, %v2271_v32 }
  0x24   :  { %v271_v10 = vmul.f32 0.5, %v255_v11  ;;  %v291_v37 = vmul.f32 %v2383_v56, %v2383_v56  ;;  %v292_v46 = vmul.f32 %v2398_v61, %v2398_v61  ;;  %v295_v11 = vmul.f32 %v2452_v31, %v2452_v31 }
  0x25   :  { %2069 = vmatmul.msk.f32.gmra.mxu1 %vm123_vm0, %v2436_v21  ;;  %v302_v4 = vmul.f32 %v270_v0, %v270_v0  ;;  %v318_v17 = vmul.f32 %v270_v0, %v2302_v62  ;;  %v272_v29 = vmul.f32 0.5, %v256_v33  ;;  %v257_v62 = vadd.f32 1.0, %v2282_v40 }
  0x26   :  { %v303_v16 = vmul.f32 %v271_v10, %v271_v10  ;;  %v319_v24 = vmul.f32 %v271_v10, %v2317_v15  ;;  %v258_v15 = vadd.f32 1.0, %v2297_v52  ;;  %v259_v52 = vadd.f32 1.0, %v2314_v9 }
  0x27   :  { %2042 = vmatmul.msk.f32.gmra.mxu0 %vm123_vm0, %v2332_v26  ;;  %v304_v20 = vmul.f32 %v272_v29, %v272_v29  ;;  %v273_v32 = vmul.f32 0.5, %v257_v62 }
  0x28   :  { %2085 = vmatmul.msk.f32.gmra.mxu2 %vm123_vm0, %v299_v34  ;;  %v320_v34 = vmul.f32 %v272_v29, %v2332_v26  ;;  %v274_v40 = vmul.f32 0.5, %v258_v15 }
  0x29   :  { %2102 = vmatmul.msk.f32.gmra.mxu3 %vm123_vm0, %v316_v63  ;;  %v321_v26 = vmul.f32 %v273_v32, %v2347_v42 }
  0x2d   :  { %2070 = vmatmul.msk.f32.gmra.mxu1 %vm123_vm0, %v284_v28  ;;  %v305_v28 = vmul.f32 %v273_v32, %v273_v32 }
  0x2f   :  { %2043 = vmatmul.msk.f32.gmra.mxu0 %vm123_vm0, %v2347_v42  ;;  %v260_v42 = vadd.f32 1.0, %v2329_v22  ;;  %v261_v22 = vadd.f32 1.0, %v2344_v36 }
  0x30   :  { %2086 = vmatmul.msk.f32.gmra.mxu2 %vm123_vm0, %v300_v44  ;;  %v275_v44 = vmul.f32 0.5, %v259_v52 }
  0x31   :  { %2103 = vmatmul.msk.f32.gmra.mxu3 %vm123_vm0, %v317_v5  ;;  %v276_v9 = vmul.f32 0.5, %v260_v42  ;;  %v277_v6 = vmul.f32 0.5, %v261_v22 }
  0x32   :  { %v307_v47 = vmul.f32 %v275_v44, %v275_v44 }
  0x33   :  { %v324_v5 = vmul.f32 %v276_v9, %v2398_v61 }
  0x35   :  { %2071 = vmatmul.msk.f32.gmra.mxu1 %vm123_vm0, %v285_v43 }
  0x37   :  { %2044 = vmatmul.msk.f32.gmra.mxu0 %vm123_vm0, %v2368_v50 }
  0x38   :  { %2087 = vmatmul.msk.f32.gmra.mxu2 %vm123_vm0, %v301_v58  ;;  %v308_v58 = vmul.f32 %v276_v9, %v276_v9 }
  0x39   :  { %2104 = vmatmul.msk.f32.gmra.mxu3 %vm123_vm0, %v318_v17  ;;  %v296_v17 = vmul.f32 %v2461_v41, %v2461_v41 }
  0x3d   :  { %2072 = vmatmul.msk.f32.gmra.mxu1 %vm123_vm0, %v286_v57  ;;  %v293_v57 = vmul.f32 %v2423_v13, %v2423_v13 }
  0x3f   :  { %2045 = vmatmul.msk.f32.gmra.mxu0 %vm123_vm0, %v2383_v56 }
  0x40   :  { %2088 = vmatmul.msk.f32.gmra.mxu2 %vm123_vm0, %v302_v4 }
  0x41   :  { %2105 = vmatmul.msk.f32.gmra.mxu3 %vm123_vm0, %v319_v24 }
  0x45   :  { %2073 = vmatmul.msk.f32.gmra.mxu1 %vm123_vm0, %v287_v1  ;;  %v309_v1 = vmul.f32 %v277_v6, %v277_v6 }
  0x47   :  { %2046 = vmatmul.msk.f32.gmra.mxu0 %vm123_vm0, %v2398_v61  ;;  %v325_v61 = vmul.f32 %v277_v6, %v2423_v13 }
  0x48   :  { %2089 = vmatmul.msk.f32.gmra.mxu2 %vm123_vm0, %v303_v16 }
  0x49   :  { %2106 = vmatmul.msk.f32.gmra.mxu3 %vm123_vm0, %v320_v34  ;;  %v49_v34 = vld [vmem:[%s3216_s2] sm:$0x3f] }
  0x4d   :  { %2074 = vmatmul.msk.f32.gmra.mxu1 %vm123_vm0, %v288_v14 }
  0x4f   :  { %2047 = vmatmul.msk.f32.gmra.mxu0 %vm123_vm0, %v2423_v13  ;;  %v264_v13 = vadd.f32 1.0, %v2393_v59  ;;  %v265_v59 = vadd.f32 1.0, %v2416_v7  ;;  %v314_v7 = vmul.f32 %v2421_v12, %v2421_v12 }
  0x50   :  { %2090 = vmatmul.msk.f32.gmra.mxu2 %vm123_vm0, %v304_v20  ;;  %v297_v20 = vmul.f32 %v2473_v51, %v2473_v51 }
  0x51   :  { %2107 = vmatmul.msk.f32.gmra.mxu3 %vm123_vm0, %v321_v26  ;;  %v281_v62 = vmul.f32 0.5, %v265_v59 }
  0x55   :  { %2075 = vmatmul.msk.f32.gmra.mxu1 %vm123_vm0, %v289_v19 }
  0x57   :  { %2048 = vmatmul.msk.f32.gmra.mxu0 %vm123_vm0, %v2438_v23 }
  0x58   :  { %2091 = vmatmul.msk.f32.gmra.mxu2 %vm123_vm0, %v305_v28 }
  0x5d   :  { %2076 = vmatmul.msk.f32.gmra.mxu1 %vm123_vm0, %v290_v27 }
  0x5f   :  { %2049 = vmatmul.msk.f32.gmra.mxu0 %vm123_vm0, %v2452_v31 }
  0x65   :  { %2077 = vmatmul.msk.f32.gmra.mxu1 %vm123_vm0, %v291_v37  ;;  %v330_v37 = vmul.f32 %v2421_v12, %v2432_v18  ;;  %v331_v12 = vmul.f32 %v2436_v21, %v2450_v30 }
  0x67   :  { %2050 = vmatmul.msk.f32.gmra.mxu0 %vm123_vm0, %v2461_v41 }
  0x6d   :  { %2078 = vmatmul.msk.f32.gmra.mxu1 %vm123_vm0, %v292_v46  ;;  %v51_v46 = vld [vmem:[%s3216_s2 + $0x10] sm:$0x3f] }
  0x6f   :  { %2051 = vmatmul.msk.f32.gmra.mxu0 %vm123_vm0, %v2473_v51 }
  0x75   :  { %2079 = vmatmul.msk.f32.gmra.mxu1 %vm123_vm0, %v293_v57 }
  0x77   :  { %2052 = vmatmul.msk.f32.gmra.mxu0 %vm123_vm0, %v2432_v18 }
  0x7f   :  { %2053 = vmatmul.msk.f32.gmra.mxu0 %vm123_vm0, %v2450_v30 }
  0x84   :  { %v589_v25 = vpop.f32.mrf.mxu0 }
  0x87   :  { %2054 = vmatmul.msk.f32.gmra.mxu0 %vm123_vm0, %v268_v38  ;;  %v306_v38 = vmul.f32 %v274_v40, %v274_v40 }
  0x89   :  { %2092 = vmatmul.msk.f32.gmra.mxu2 %vm123_vm0, %v306_v38  ;;  %v50_v38 = vld [vmem:[%s3216_s2 + $0x8] sm:$0x3f] }
  0x8c   :  { %v592_v35 = vpop.f32.mrf.mxu0 }
  0x8d   :  { %846 = vmatpush.msrb.mxu1 %v592_v35 }
  0x8f   :  { %2055 = vmatmul.msk.f32.gmra.mxu0 %vm123_vm0, %v269_v53  ;;  %847 = vmatpush.msrb.mxu1 %v589_v25  ;;  %v322_v53 = vmul.f32 %v274_v40, %v2368_v50  ;;  %v323_v50 = vmul.f32 %v275_v44, %v2383_v56  ;;  %v262_v56 = vadd.f32 1.0, %v2363_v48  ;;  %v263_v48 = vadd.f32 1.0, %v2378_v54 }
  0x90   :  { %v280_v54 = vmul.f32 0.5, %v264_v13  ;;  %v58_v13 = vld [vmem:[%s3216_s2 + $0x48] sm:$0x3f] }
  0x91   :  { %2093 = vmatmul.msk.f32.gmra.mxu2 %vm123_vm0, %v307_v47  ;;  %2108 = vmatmul.msk.f32.gmra.mxu3 %vm123_vm0, %v322_v53  ;;  %v278_v36 = vmul.f32 0.5, %v262_v56  ;;  %v279_v16 = vmul.f32 0.5, %v263_v48 }
  0x92   :  { %v312_v24 = vmul.f32 %v280_v54, %v280_v54  ;;  %v328_v28 = vmul.f32 %v280_v54, %v2461_v41  ;;  %v329_v41 = vmul.f32 %v281_v62, %v2473_v51 }
  0x93   :  { %v311_v33 = vmul.f32 %v279_v16, %v279_v16  ;;  %v326_v19 = vmul.f32 %v278_v36, %v2438_v23 }
  0x94   :  { %v595_v43 = vpop.f32.mrf.mxu0 }
  0x97   :  { %2056 = vmatmul.msk.f32.gmra.mxu0 %vm123_vm0, %v270_v0  ;;  %v294_v0 = vmul.f32 %v2438_v23, %v2438_v23  ;;  %v327_v23 = vmul.f32 %v279_v16, %v2452_v31 }
  0x99   :  { %2094 = vmatmul.msk.f32.gmra.mxu2 %vm123_vm0, %v308_v58  ;;  %2109 = vmatmul.msk.f32.gmra.mxu3 %vm123_vm0, %v323_v50 }
  0x9a   :  { %2080 = vmatmul.msk.f32.gmra.mxu1 %vm123_vm0, %v294_v0  ;;  %v2584_v35 = vpop.f32.mrf.mxu1 }
  0x9c   :  { %v598_v3 = vpop.f32.mrf.mxu0 }
  0x9d   :  { %869 = vmatpush.msrb.mxu2 %v598_v3 }
  0x9f   :  { %2057 = vmatmul.msk.f32.gmra.mxu0 %vm123_vm0, %v271_v10  ;;  %870 = vmatpush.msrb.mxu2 %v595_v43  ;;  %v310_v10 = vmul.f32 %v278_v36, %v278_v36 }
  0xa1   :  { %2095 = vmatmul.msk.f32.gmra.mxu2 %vm123_vm0, %v309_v1  ;;  %2110 = vmatmul.msk.f32.gmra.mxu3 %vm123_vm0, %v324_v5 }
  0xa2   :  { %2081 = vmatmul.msk.f32.gmra.mxu1 %vm123_vm0, %v295_v11 }
  0xa3   :  { %v2597_v26 = vpop.f32.mrf.mxu2 }
  0xa4   :  { %v601_v63 = vpop.f32.mrf.mxu0  ;;  %v2619_v30 = vpop.f32.mrf.mxu3 }
  0xa7   :  { %2058 = vmatmul.msk.f32.gmra.mxu0 %vm123_vm0, %v272_v29 }
  0xa9   :  { %2096 = vmatmul.msk.f32.gmra.mxu2 %vm123_vm0, %v310_v10  ;;  %2111 = vmatmul.msk.f32.gmra.mxu3 %vm123_vm0, %v325_v61  ;;  %v54_v61 = vld [vmem:[%s3216_s2 + $0x28] sm:$0x3f] }
  0xaa   :  { %2082 = vmatmul.msk.f32.gmra.mxu1 %vm123_vm0, %v296_v17  ;;  %v55_v17 = vld [vmem:[%s3216_s2 + $0x30] sm:$0x3f] }
  0xab   :  { %v2606_v18 = vpop.f32.mrf.mxu2 }
  0xac   :  { %v604_v4 = vpop.f32.mrf.mxu0  ;;  %v2628_v57 = vpop.f32.mrf.mxu3 }
  0xad   :  { %892 = vmatpush.msrb.mxu3 %v604_v4  ;;  %v53_v4 = vld [vmem:[%s3216_s2 + $0x20] sm:$0x3f] }
  0xaf   :  { %2059 = vmatmul.msk.f32.gmra.mxu0 %vm123_vm0, %v273_v32  ;;  %893 = vmatpush.msrb.mxu3 %v601_v63  ;;  %v313_v32 = vmul.f32 %v281_v62, %v281_v62 }
  0xb1   :  { %2097 = vmatmul.msk.f32.gmra.mxu2 %vm123_vm0, %v311_v33  ;;  %2112 = vmatmul.msk.f32.gmra.mxu3 %vm123_vm0, %v326_v19 }
  0xb2   :  { %2083 = vmatmul.msk.f32.gmra.mxu1 %vm123_vm0, %v297_v20 }
  0xb4   :  { %v607_v14 = vpop.f32.mrf.mxu0  ;;  %v2635_v22 = vpop.f32.mrf.mxu3 }
  0xb7   :  { %2060 = vmatmul.msk.f32.gmra.mxu0 %vm123_vm0, %v274_v40  ;;  %v2590_v40 = vpop.f32.mrf.mxu1 }
  0xb9   :  { %2098 = vmatmul.msk.f32.gmra.mxu2 %vm123_vm0, %v312_v24  ;;  %2113 = vmatmul.msk.f32.gmra.mxu3 %vm123_vm0, %v327_v23  ;;  %v57_v24 = vld [vmem:[%s3216_s2 + $0x40] sm:$0x3f] }
  0xba   :  { %2118 = vmatmul.msk.f32.vlgmr.msrb.gmra.mxu1 %vm123_vm0, %v49_v34 }
  0xbc   :  { %v610_v29 = vpop.f32.mrf.mxu0  ;;  %v2644_v5 = vpop.f32.mrf.mxu3 }
  0xbd   :  { %915 = vmatpush.msra.mxu1 %v610_v29 }
  0xbf   :  { %2061 = vmatmul.msk.f32.gmra.mxu0 %vm123_vm0, %v275_v44  ;;  %916 = vmatpush.msra.mxu1 %v607_v14  ;;  %v2602_v43 = vpop.f32.mrf.mxu1  ;;  %v2610_v44 = vpop.f32.mrf.mxu2 }
  0xc1   :  { %2099 = vmatmul.msk.f32.gmra.mxu2 %vm123_vm0, %v313_v32  ;;  %2114 = vmatmul.msk.f32.gmra.mxu3 %vm123_vm0, %v328_v28 }
  0xc4   :  { %v613_v25 = vpop.f32.mrf.mxu0  ;;  %v2649_v11 = vpop.f32.mrf.mxu3 }
  0xc7   :  { %2062 = vmatmul.msk.f32.gmra.mxu0 %vm123_vm0, %v276_v9  ;;  %v2615_v47 = vpop.f32.mrf.mxu1  ;;  %v2621_v3 = vpop.f32.mrf.mxu2  ;;  %v52_v9 = vld [vmem:[%s3216_s2 + $0x18] sm:$0x3f] }
  0xc8   :  { %2121 = vmatmul.msk.f32.vlgmr.msra.gmra.mxu1 %vm123_vm0, %v52_v9 }
  0xc9   :  { %2100 = vmatmul.msk.f32.gmra.mxu2 %vm123_vm0, %v314_v7  ;;  %2115 = vmatmul.msk.f32.gmra.mxu3 %vm123_vm0, %v329_v41  ;;  %v60_v41 = vld [vmem:[%s3216_s2 + $0x58] sm:$0x3f] }
  0xcc   :  { %v616_v27 = vpop.f32.mrf.mxu0  ;;  %v2654_v48 = vpop.f32.mrf.mxu3 }
  0xcd   :  { %938 = vmatpush.msra.mxu2 %v616_v27 }
  0xcf   :  { %2063 = vmatmul.msk.f32.gmra.mxu0 %vm123_vm0, %v277_v6  ;;  %939 = vmatpush.msra.mxu2 %v613_v25  ;;  %v2623_v53 = vpop.f32.mrf.mxu1  ;;  %v2631_v58 = vpop.f32.mrf.mxu2 }
  0xd1   :  { %2119 = vmatmul.msk.f32.vlgmr.msrb.gmra.mxu2 %vm123_vm0, %v50_v38  ;;  %2116 = vmatmul.msk.f32.gmra.mxu3 %vm123_vm0, %v330_v37 }
  0xd4   :  { %v619_v31 = vpop.f32.mrf.mxu0  ;;  %v2665_v19 = vpop.f32.mrf.mxu3 }
  0xd7   :  { %2064 = vmatmul.msk.f32.gmra.mxu0 %vm123_vm0, %v278_v36  ;;  %v2633_v63 = vpop.f32.mrf.mxu1  ;;  %v2637_v6 = vpop.f32.mrf.mxu2 }
  0xd9   :  { %2117 = vmatmul.msk.f32.gmra.mxu3 %vm123_vm0, %v331_v12  ;;  %2122 = vmatmul.msk.f32.vlgmr.msra.gmra.mxu2 %vm123_vm0, %v53_v4 }
  0xdc   :  { %v622_v15 = vpop.f32.mrf.mxu0 }
  0xdd   :  { %961 = vmatpush.msra.mxu3 %v622_v15 }
  0xdf   :  { %2065 = vmatmul.msk.f32.gmra.mxu0 %vm123_vm0, %v279_v16  ;;  %962 = vmatpush.msra.mxu3 %v619_v31  ;;  %v2639_v1 = vpop.f32.mrf.mxu1  ;;  %v2647_v36 = vpop.f32.mrf.mxu2 }
  0xe1   :  { %2120 = vmatmul.msk.f32.vlgmr.msrb.gmra.mxu3 %vm123_vm0, %v51_v46 }
  0xe4   :  { %v625_v51 = vpop.f32.mrf.mxu0 }
  0xe7   :  { %2066 = vmatmul.msk.f32.gmra.mxu0 %vm123_vm0, %v280_v54  ;;  %v700_v10 = vpop.f32.mrf.mxu1  ;;  %v2657_v16 = vpop.f32.mrf.mxu2  ;;  %v56_v54 = vld [vmem:[%s3216_s2 + $0x38] sm:$0x3f] }
  0xe9   :  { %2123 = vmatmul.msk.f32.vlgmr.msra.gmra.mxu3 %vm123_vm0, %v54_v61 }
  0xec   :  { %v628_v52 = vpop.f32.mrf.mxu0 }
  0xed   :  { %984 = vmatpush.msrb.mxu1 %v628_v52 }
  0xef   :  { %2067 = vmatmul.msk.f32.gmra.mxu0 %vm123_vm0, %v281_v62  ;;  %985 = vmatpush.msrb.mxu1 %v625_v51  ;;  %v2662_v33 = vpop.f32.mrf.mxu1  ;;  %v59_v62 = vld [vmem:[%s3216_s2 + $0x50] sm:$0x3f] }
  0xf0   :  { %2124 = vmatmul.msk.f32.vlgmr.msrb.gmra.mxu1 %vm123_vm0, %v55_v17  ;;  %v65_v17 = vld [vmem:[%s3216_s2 + $0x80] sm:$0x3f] }
  0xf4   :  { %v631_v21 = vpop.f32.mrf.mxu0 }
  0xf7   :  { %v706_v25 = vpop.f32.mrf.mxu1 }
  0xfc   :  { %v634_v42 = vpop.f32.mrf.mxu0 }
  0xfd   :  { %1007 = vmatpush.msrb.mxu2 %v634_v42 }
  0xff   :  { %1008 = vmatpush.msrb.mxu2 %v631_v21  ;;  %v2687_v28 = vpop.f32.mrf.mxu1  ;;  %v61_v21 = vld [vmem:[%s3216_s2 + $0x60] sm:$0x3f] }
 0x100   :  { %2125 = vmatmul.msk.f32.vlgmr.msrb.gmra.mxu2 %vm123_vm0, %v56_v54  ;;  %v73_v54 = vld [vmem:[%s3216_s2 + $0xc0] sm:$0x3f] }
 0x104   :  { %v637_v50 = vpop.f32.mrf.mxu0 }
 0x107   :  { %v2696_v15 = vpop.f32.mrf.mxu1 }
 0x10c   :  { %v640_v0 = vpop.f32.mrf.mxu0  ;;  %v2675_v20 = vpop.f32.mrf.mxu2 }
 0x10d   :  { %1030 = vmatpush.msrb.mxu3 %v640_v0  ;;  %v64_v0 = vld [vmem:[%s3216_s2 + $0x78] sm:$0x3f] }
 0x10f   :  { %1031 = vmatpush.msrb.mxu3 %v637_v50 }
 0x110   :  { %2126 = vmatmul.msk.f32.vlgmr.msrb.gmra.mxu3 %vm123_vm0, %v57_v24 }
 0x114   :  { %v643_v56 = vpop.f32.mrf.mxu0  ;;  %v2681_v59 = vpop.f32.mrf.mxu3 }
 0x115   :  { %v754_v32 = vpop.f32.mrf.mxu2 }
 0x117   :  { %v715_v12 = vpop.f32.mrf.mxu1 }
 0x11c   :  { %v646_v14 = vpop.f32.mrf.mxu0  ;;  %v2689_v34 = vpop.f32.mrf.mxu3 }
 0x11d   :  { %1053 = vmatpush.msra.mxu1 %v646_v14  ;;  %v2691_v31 = vpop.f32.mrf.mxu2 }
 0x11f   :  { %1054 = vmatpush.msra.mxu1 %v643_v56  ;;  %v718_v9 = vpop.f32.mrf.mxu1 }
 0x120   :  { %2127 = vmatmul.msk.f32.vlgmr.msra.gmra.mxu1 %vm123_vm0, %v58_v13 }
 0x124   :  { %v649_v29 = vpop.f32.mrf.mxu0  ;;  %v2699_v37 = vpop.f32.mrf.mxu3 }
 0x125   :  { %v2701_v51 = vpop.f32.mrf.mxu2 }
 0x127   :  { %v721_v14 = vpop.f32.mrf.mxu1 }
 0x12c   :  { %v652_v23 = vpop.f32.mrf.mxu0  ;;  %v2703_v52 = vpop.f32.mrf.mxu3 }
 0x12d   :  { %1076 = vmatpush.msra.mxu2 %v652_v23  ;;  %v2710_v42 = vpop.f32.mrf.mxu2  ;;  %v79_v23 = vld [vmem:[%s3216_s2 + $0xf0] sm:$0x3f] }
 0x12f   :  { %1077 = vmatpush.msra.mxu2 %v649_v29  ;;  %v70_v29 = vld [vmem:[%s3216_s2 + $0xa8] sm:$0x3f] }
 0x130   :  { %2128 = vmatmul.msk.f32.vlgmr.msra.gmra.mxu2 %vm123_vm0, %v59_v62  ;;  %v75_v62 = vld [vmem:[%s3216_s2 + $0xd0] sm:$0x3f] }
 0x134   :  { %v655_v27 = vpop.f32.mrf.mxu0  ;;  %v2716_v4 = vpop.f32.mrf.mxu3 }
 0x13c   :  { %v658_v7 = vpop.f32.mrf.mxu0  ;;  %v2728_v61 = vpop.f32.mrf.mxu3 }
 0x13d   :  { %1099 = vmatpush.msra.mxu3 %v658_v7 }
 0x13f   :  { %1100 = vmatpush.msra.mxu3 %v655_v27  ;;  %v85_v27 = vld [vmem:[%s3216_s2 + $0x120] sm:$0x3f] }
 0x140   :  { %2129 = vmatmul.msk.f32.vlgmr.msra.gmra.mxu3 %vm123_vm0, %v60_v41  ;;  %v86_v41 = vld [vmem:[%s3216_s2 + $0x128] sm:$0x3f] }
 0x144   :  { %v661_v38 = vpop.f32.mrf.mxu0 }
 0x14c   :  { %v664_v46 = vpop.f32.mrf.mxu0 }
 0x14d   :  { %1122 = vmatpush.msrb.mxu1 %v664_v46 }
 0x14f   :  { %1123 = vmatpush.msrb.mxu1 %v661_v38 }
 0x150   :  { %2130 = vmatmul.msk.f32.vlgmr.msrb.gmra.mxu1 %vm123_vm0, %v61_v21 }
 0x151   :  { %1191 = vmatpush.msra.mxu1 %v2590_v40  ;;  %v2720_v40 = vpop.f32.mrf.mxu2 }
 0x153   :  { %1192 = vmatpush.msra.mxu1 %v2584_v35  ;;  %v62_v35 = vld [vmem:[%s3216_s2 + $0x68] sm:$0x3f] }
 0x154   :  { %v667_v50 = vpop.f32.mrf.mxu0 }
 0x155   :  { %1260 = vmatpush.msrb.mxu1 %v700_v10  ;;  %v67_v10 = vld [vmem:[%s3216_s2 + $0x90] sm:$0x3f] }
 0x157   :  { %1261 = vmatpush.msrb.mxu1 %v2639_v1 }
 0x158   :  { %2133 = vmatmul.msk.f32.vlgmr.msra.gmra.mxu1 %vm123_vm0, %v64_v0 }
 0x159   :  { %1329 = vmatpush.msra.mxu1 %v718_v9  ;;  %v769_v13 = vpop.f32.mrf.mxu2 }
 0x15b   :  { %1330 = vmatpush.msra.mxu1 %v715_v12  ;;  %v87_v12 = vld [vmem:[%s3216_s2 + $0x130] sm:$0x3f] }
 0x15c   :  { %v670_v56 = vpop.f32.mrf.mxu0 }
 0x15d   :  { %1145 = vmatpush.msrb.mxu2 %v670_v56 }
 0x15f   :  { %1146 = vmatpush.msrb.mxu2 %v667_v50 }
 0x160   :  { %2131 = vmatmul.msk.f32.vlgmr.msrb.gmra.mxu2 %vm123_vm0, %v62_v35  ;;  %2136 = vmatmul.msk.f32.vlgmr.msrb.gmra.mxu1 %vm123_vm0, %v67_v10 }
 0x161   :  { %1214 = vmatpush.msra.mxu2 %v2615_v47  ;;  %1398 = vmatpush.msrb.mxu1 %v2621_v3  ;;  %v724_v47 = vpop.f32.mrf.mxu1  ;;  %v63_v3 = vld [vmem:[%s3216_s2 + $0x70] sm:$0x3f]  ;;  %v772_v24 = vpop.f32.mrf.mxu2 }
 0x163   :  { %1215 = vmatpush.msra.mxu2 %v2602_v43  ;;  %1399 = vmatpush.msrb.mxu1 %v2610_v44  ;;  %v2745_v43 = vpop.f32.mrf.mxu3 }
 0x164   :  { %v673_v1 = vpop.f32.mrf.mxu0 }
 0x165   :  { %1283 = vmatpush.msrb.mxu2 %v706_v25  ;;  %v66_v25 = vld [vmem:[%s3216_s2 + $0x88] sm:$0x3f] }
 0x167   :  { %1284 = vmatpush.msrb.mxu2 %v2662_v33  ;;  %v68_v33 = vld [vmem:[%s3216_s2 + $0x98] sm:$0x3f] }
 0x168   :  { %2134 = vmatmul.msk.f32.vlgmr.msra.gmra.mxu2 %vm123_vm0, %v65_v17  ;;  %2139 = vmatmul.msk.f32.vlgmr.msra.gmra.mxu1 %vm123_vm0, %v70_v29 }
 0x169   :  { %1467 = vmatpush.msra.mxu1 %v754_v32  ;;  %1352 = vmatpush.msra.mxu2 %v724_v47  ;;  %v80_v32 = vld [vmem:[%s3216_s2 + $0xf8] sm:$0x3f] }
 0x16b   :  { %1468 = vmatpush.msra.mxu1 %v2675_v20  ;;  %1353 = vmatpush.msra.mxu2 %v721_v14  ;;  %v2763_v20 = vpop.f32.mrf.mxu3 }
 0x16c   :  { %v676_v44 = vpop.f32.mrf.mxu0 }
 0x16d   :  { %1168 = vmatpush.msrb.mxu3 %v676_v44 }
 0x16f   :  { %1169 = vmatpush.msrb.mxu3 %v673_v1 }
 0x170   :  { %2132 = vmatmul.msk.f32.vlgmr.msrb.gmra.mxu3 %vm123_vm0, %v63_v3  ;;  %2137 = vmatmul.msk.f32.vlgmr.msrb.gmra.mxu2 %vm123_vm0, %v68_v33 }
 0x171   :  { %1237 = vmatpush.msra.mxu3 %v2633_v63  ;;  %2142 = vmatmul.msk.f32.vlgmr.msrb.gmra.mxu1 %vm123_vm0, %v73_v54  ;;  %v71_v63 = vld [vmem:[%s3216_s2 + $0xb0] sm:$0x3f] }
 0x172   :  { %1421 = vmatpush.msrb.mxu2 %v2637_v6  ;;  %1536 = vmatpush.msrb.mxu1 %v772_v24 }
 0x173   :  { %1238 = vmatpush.msra.mxu3 %v2623_v53  ;;  %v76_v53 = vld [vmem:[%s3216_s2 + $0xd8] sm:$0x3f]  ;;  %v823_v6 = vpop.f32.mrf.mxu3 }
 0x174   :  { %1422 = vmatpush.msrb.mxu2 %v2631_v58  ;;  %1537 = vmatpush.msrb.mxu1 %v769_v13  ;;  %v69_v58 = vld [vmem:[%s3216_s2 + $0xa0] sm:$0x3f] }
 0x175   :  { %1306 = vmatpush.msrb.mxu3 %v2696_v15 }
 0x177   :  { %1307 = vmatpush.msrb.mxu3 %v2687_v28  ;;  %v83_v28 = vld [vmem:[%s3216_s2 + $0x110] sm:$0x3f] }
 0x178   :  { %2135 = vmatmul.msk.f32.vlgmr.msra.gmra.mxu3 %vm123_vm0, %v66_v25  ;;  %2140 = vmatmul.msk.f32.vlgmr.msra.gmra.mxu2 %vm123_vm0, %v71_v63 }
 0x179   :  { %1375 = vmatpush.msra.mxu3 %v2606_v18  ;;  %2145 = vmatmul.msk.f32.vlgmr.msra.gmra.mxu1 %vm123_vm0, %v76_v53  ;;  %v74_v18 = vld [vmem:[%s3216_s2 + $0xc8] sm:$0x3f] }
 0x17a   :  { %1490 = vmatpush.msra.mxu2 %v2701_v51  ;;  %1605 = vmatpush.msra.mxu1 %v2649_v11  ;;  %v77_v11 = vld [vmem:[%s3216_s2 + $0xe0] sm:$0x3f] }
 0x17b   :  { %1376 = vmatpush.msra.mxu3 %v2597_v26  ;;  %v775_v26 = vpop.f32.mrf.mxu2 }
 0x17c   :  { %1491 = vmatpush.msra.mxu2 %v2691_v31  ;;  %1606 = vmatpush.msra.mxu1 %v2644_v5  ;;  %v72_v5 = vld [vmem:[%s3216_s2 + $0xb8] sm:$0x3f]  ;;  %v81_v31 = vld [vmem:[%s3216_s2 + $0x100] sm:$0x3f] }
 0x180   :  { %2138 = vmatmul.msk.f32.vlgmr.msrb.gmra.mxu3 %vm123_vm0, %v69_v58  ;;  %2143 = vmatmul.msk.f32.vlgmr.msrb.gmra.mxu2 %vm123_vm0, %v74_v18 }
 0x181   :  { %1444 = vmatpush.msrb.mxu3 %v2657_v16  ;;  %2148 = vmatmul.msk.f32.vlgmr.msrb.gmra.mxu1 %vm123_vm0, %v79_v23  ;;  %v82_v16 = vld [vmem:[%s3216_s2 + $0x108] sm:$0x3f]  ;;  %v117_v23 = vmul.f32 %v2366_v49, %v2366_v49 }
 0x182   :  { %1559 = vmatpush.msrb.mxu2 %v2619_v30  ;;  %1674 = vmatpush.msrb.mxu1 %v2703_v52  ;;  %v826_v30 = vpop.f32.mrf.mxu3 }
 0x183   :  { %1445 = vmatpush.msrb.mxu3 %v2647_v36  ;;  %v849_v36 = vpop.f32.mrf.mxu1 }
 0x184   :  { %1675 = vmatpush.msrb.mxu1 %v2699_v37  ;;  %1560 = vmatpush.msrb.mxu2 %v775_v26  ;;  %v1749_v1 = vmul.f32 %v849_v36, %v849_v36  ;;  %v174_v26 = vand.u32 2147483647, %v2366_v49 }
 0x188   :  { %2141 = vmatmul.msk.f32.vlgmr.msra.gmra.mxu3 %vm123_vm0, %v72_v5  ;;  %2146 = vmatmul.msk.f32.vlgmr.msra.gmra.mxu2 %vm123_vm0, %v77_v11 }
 0x189   :  { %1513 = vmatpush.msra.mxu3 %v2720_v40  ;;  %2151 = vmatmul.msk.f32.vlgmr.msra.gmra.mxu1 %vm123_vm0, %v82_v16 }
 0x18a   :  { %1628 = vmatpush.msra.mxu2 %v2665_v19  ;;  %1743 = vmatpush.msra.mxu1 %v826_v30  ;;  %v78_v19 = vld [vmem:[%s3216_s2 + $0xe8] sm:$0x3f]  ;;  %v895_v7 = vpop.f32.mrf.mxu3 }
 0x18b   :  { %1514 = vmatpush.msra.mxu3 %v2710_v42 }
 0x18c   :  { %1629 = vmatpush.msra.mxu2 %v2654_v48  ;;  %1744 = vmatpush.msra.mxu1 %v823_v6  ;;  %v918_v48 = vpop.f32.mrf.mxu1 }
 0x18d   :  { %v1752_v3 = vmul.f32 %v918_v48, %v918_v48 }
 0x190   :  { %2144 = vmatmul.msk.f32.vlgmr.msrb.gmra.mxu3 %vm123_vm0, %v75_v62  ;;  %2149 = vmatmul.msk.f32.vlgmr.msrb.gmra.mxu2 %vm123_vm0, %v80_v32 }
 0x191   :  { %1582 = vmatpush.msrb.mxu3 %v2635_v22  ;;  %2154 = vmatmul.msk.f32.vlgmr.msrb.gmra.mxu1 %vm123_vm0, %v85_v27  ;;  %v88_v22 = vld [vmem:[%s3216_s2 + $0x138] sm:$0x3f]  ;;  %v2894_v27 = vsel %vm123_vm0, %v117_v23, 0.0 }
 0x192   :  { %1697 = vmatpush.msrb.mxu2 %v2728_v61  ;;  %v2864_v38 = vpop.f32.mrf.mxu3 }
 0x193   :  { %1583 = vmatpush.msrb.mxu3 %v2628_v57  ;;  %v872_v57 = vpop.f32.mrf.mxu2 }
 0x194   :  { %1698 = vmatpush.msrb.mxu2 %v2716_v4  ;;  %v2855_v15 = vpop.f32.mrf.mxu1  ;;  %v1750_v11 = vmul.f32 %v872_v57, %v872_v57 }
 0x198   :  { %2147 = vmatmul.msk.f32.vlgmr.msra.gmra.mxu3 %vm123_vm0, %v78_v19  ;;  %2152 = vmatmul.msk.f32.vlgmr.msra.gmra.mxu2 %vm123_vm0, %v83_v28  ;;  %v2901_v19 = vmul.f32 %v2381_v55, %v2381_v55 }
 0x199   :  { %1651 = vmatpush.msra.mxu3 %v2689_v34  ;;  %2157 = vmatmul.msk.f32.vlgmr.msra.gmra.mxu1 %vm123_vm0, %v88_v22  ;;  %v84_v34 = vld [vmem:[%s3216_s2 + $0x118] sm:$0x3f]  ;;  %v2905_v22 = vmul.f32 %v895_v7, %v895_v7 }
 0x19a   :  { %v1033_v46 = vpop.f32.mrf.mxu3 }
 0x19b   :  { %1652 = vmatpush.msra.mxu3 %v2681_v59  ;;  %v941_v59 = vpop.f32.mrf.mxu2  ;;  %v2873_v21 = vmul.f32 %v1033_v46, %v849_v36  ;;  %v1757_v17 = vmul.f32 %v1033_v46, %v1033_v46 }
 0x19d   :  { %v1056_v37 = vpop.f32.mrf.mxu1 }
 0x19e   :  { %v2866_v51 = vmul.f32 %v1056_v37, %v872_v57  ;;  %v1758_v16 = vmul.f32 %v1056_v37, %v1056_v37 }
 0x1a0   :  { %2150 = vmatmul.msk.f32.vlgmr.msrb.gmra.mxu3 %vm123_vm0, %v81_v31  ;;  %2155 = vmatmul.msk.f32.vlgmr.msrb.gmra.mxu2 %vm123_vm0, %v86_v41  ;;  %v1798_v49 = vmul.f32 2.0, %v2866_v51  ;;  %v1838_v37 = vadd.f32 %v1758_v16, %v1750_v11 }
 0x1a1   :  { %1720 = vmatpush.msrb.mxu3 %v2763_v20 }
 0x1a3   :  { %1721 = vmatpush.msrb.mxu3 %v2745_v43  ;;  %v1010_v52 = vpop.f32.mrf.mxu2  ;;  %v1837_v43 = vadd.f32 %v1757_v17, %v1749_v1 }
 0x1a5   :  { %v1845_v25 = vadd.f32 0.0001, %v1837_v43 }
 0x1a8   :  { %2153 = vmatmul.msk.f32.vlgmr.msra.gmra.mxu3 %vm123_vm0, %v84_v34  ;;  %v1755_v34 = vmul.f32 %v2855_v15, %v2855_v15 }
 0x1b0   :  { %2156 = vmatmul.msk.f32.vlgmr.msrb.gmra.mxu3 %vm123_vm0, %v87_v12  ;;  %v2914_v12 = vmul.f32 %v941_v59, %v941_v59 }
 0x1b3   :  { %v1079_v42 = vpop.f32.mrf.mxu2 }
 0x1b4   :  { %v2875_v9 = vmul.f32 %v1079_v42, %v895_v7  ;;  %v2907_v57 = vmul.f32 %v1079_v42, %v1079_v42  ;;  %v1797_v7 = vmul.f32 2.0, %v2873_v21 }
 0x1c3   :  { %v1102_v50 = vpop.f32.mrf.mxu3 }
 0x1c4   :  { %v2877_v0 = vmul.f32 %v1102_v50, %v918_v48  ;;  %v1760_v33 = vmul.f32 %v1102_v50, %v1102_v50  ;;  %v2897_v48 = vsel %vm123_vm0, %v174_v26, 0.0  ;;  %v2918_v50 = vmul.f32 %v2864_v38, %v2864_v38 }
 0x1c6   :  { %v1840_v53 = vadd.f32 %v1760_v33, %v1752_v3 }
 0x1c8   :  { %v1848_v30 = vadd.f32 0.0001, %v1840_v53 }
 0x1cd   :  { %v1125_v4 = vpop.f32.mrf.mxu1 }
 0x1ce   :  { %v2879_v40 = vmul.f32 %v1125_v4, %v941_v59  ;;  %v1799_v59 = vmul.f32 2.0, %v2875_v9 }
 0x1d5   :  { %v1194_v56 = vpop.f32.mrf.mxu1 }
 0x1dd   :  { %v2881_v14 = vpop.f32.mrf.mxu1 }
 0x1e3   :  { %v1148_v35 = vpop.f32.mrf.mxu2 }
 0x1e5   :  { %v2883_v10 = vpop.f32.mrf.mxu1 }
 0x1eb   :  { %v1217_v61 = vpop.f32.mrf.mxu2 }
 0x1ec   :  { %v1773_v13 = vsub.f32 %v1217_v61, %v1749_v1  ;;  %v2920_v61 = vmul.f32 %v1125_v4, %v1125_v4  ;;  %v2925_v1 = vadd.f32 0.0001, %v1798_v49  ;;  %v1839_v4 = vadd.f32 %v2907_v57, %v2905_v22 }
 0x1ee   :  { %v1401_v29 = vpop.f32.mrf.mxu1 }
 0x1ef   :  { %v1781_v47 = vsub.f32 %v1401_v29, %v1757_v17  ;;  %v2927_v17 = vmul.f32 %v1010_v52, %v1010_v52  ;;  %v2929_v29 = vmul.f32 %v1194_v56, %v1010_v52  ;;  %v2942_v52 = vmul.f32 %v1148_v35, %v2864_v38 }
 0x1f1   :  { %v1853_v44 = vadd.f32 %v1781_v47, %v1773_v13  ;;  %v2934_v47 = vmul.f32 %v1194_v56, %v1194_v56  ;;  %v2948_v56 = vmul.f32 %v1148_v35, %v1148_v35  ;;  %v1802_v49 = vmul.f32 2.0, %v2942_v52 }
 0x1f3   :  { %v1861_v54 = vadd.f32 0.0009, %v1853_v44  ;;  %v2885_v24 = vpop.f32.mrf.mxu3  ;;  %v1286_v20 = vpop.f32.mrf.mxu2  ;;  %v1846_v44 = vadd.f32 0.0001, %v1838_v37  ;;  %v1844_v38 = vadd.f32 %v2934_v47, %v2927_v17 }
 0x1f4   :  { %v1776_v18 = vsub.f32 %v1286_v20, %v1752_v3  ;;  %v1763_v42 = vmul.f32 %v2885_v24, %v2885_v24  ;;  %v1801_v3 = vmul.f32 2.0, %v2879_v40  ;;  %v2946_v20 = vadd.f32 0.0001, %v1797_v7 }
 0x1f5   :  { %v2887_v58 = vmul.f32 %v1861_v54, %v1845_v25  ;;  %v1841_v54 = vadd.f32 %v2920_v61, %v2914_v12 }
 0x1f6   :  { %v1470_v63 = vpop.f32.mrf.mxu1  ;;  %v2959_v35 = vadd.f32 0.0001, %v1801_v3 }
 0x1f7   :  { %v1784_v6 = vsub.f32 %v1470_v63, %v1760_v33  ;;  %2170 = vrcp.f32 %v2887_v58  ;;  %v1800_v33 = vmul.f32 2.0, %v2877_v0  ;;  %v1849_v7 = vadd.f32 0.0001, %v1841_v54 }
 0x1f8   :  { %vm1882_vm1 = vweird.f32 %v2887_v58 }
 0x1f9   :  { %v1856_v5 = vadd.f32 %v1784_v6, %v1776_v18  ;;  %v1804_v18 = vmul.f32 2.0, %v2929_v29 }
 0x1fb   :  { %v1864_v36 = vadd.f32 0.0009, %v1856_v5  ;;  %v1240_v62 = vpop.f32.mrf.mxu3  ;;  %v1355_v32 = vpop.f32.mrf.mxu2  ;;  %v2955_v5 = vadd.f32 0.0001, %v1799_v59 }
 0x1fc   :  { %v1779_v25 = vsub.f32 %v1355_v32, %v1755_v34  ;;  %v1774_v23 = vsub.f32 %v1240_v62, %v1750_v11  ;;  %v2961_v32 = vadd.f32 0.0001, %v1800_v33  ;;  %v1842_v11 = vadd.f32 %v2948_v56, %v2918_v50 }
 0x1fd   :  { %v2909_v31 = vmul.f32 %v1864_v36, %v1848_v30  ;;  %v2932_v13 = vpop.eup %2170  ;;  %v2957_v30 = vadd.f32 0.0001, %v1839_v4  ;;  %v1843_v62 = vadd.f32 %v1763_v42, %v1755_v34  ;;  %v119_v4 = vmul.f32 %v2396_v60, %v2396_v60 }
 0x1fe   :  { %v1539_v46 = vpop.f32.mrf.mxu1  ;;  %v1878_v6 = vmul.f32 %v2932_v13, %v2887_v58  ;;  %vm1883_vm2 = vweird.f32 %v2932_v13 }
 0x1ff   :  { %2172 = vrcp.f32 %v2909_v31  ;;  %v1787_v43 = vsub.f32 %v1539_v46, %v1763_v42  ;;  %v2988_v42 = vadd.f32 0.0001, %v1842_v11  ;;  %vm1927_vm3 = vweird.f32 %v2909_v31  ;;  %vm3062_vm7 = vmor %vm1882_vm1, %vm1883_vm2 }
 0x200   :  { %v1879_v33 = vsub.f32 1.0, %v1878_v6 }
 0x201   :  { %v1859_v36 = vadd.f32 %v1787_v43, %v1779_v25  ;;  %v2974_v43 = vadd.f32 0.0001, %v1804_v18  ;;  %v2976_v25 = vadd.f32 0.0001, %v1844_v38  ;;  %v1851_v38 = vadd.f32 0.0001, %v1843_v62 }
 0x202   :  { %v144_v18 = vadd.f32 %v2894_v27, %v2351_v39  ;;  %v147_v39 = vsel %vm123_vm0, %v119_v4, 0.0 }
 0x203   :  { %v1309_v63 = vpop.f32.mrf.mxu3  ;;  %v1424_v53 = vpop.f32.mrf.mxu2  ;;  %3218 = vst [vmem:[#allocation2_spill] sm:$0xff] %v2974_v43 }
 0x204   :  { %v1782_v26 = vsub.f32 %v1424_v53, %v1758_v16  ;;  %v2970_v16 = vmul.f32 %v2885_v24, %v2855_v15  ;;  %v1867_v53 = vadd.f32 0.0009, %v1859_v36  ;;  %v1777_v11 = vsub.f32 %v1309_v63, %v2914_v12 }
 0x205   :  { %v2964_v46 = vpop.eup %2172  ;;  %v120_v12 = vmul.f32 %v2419_v8, %v2419_v8 }
 0x206   :  { %v1854_v37 = vadd.f32 %v1782_v26, %v1774_v23  ;;  %v1608_v59 = vpop.f32.mrf.mxu1  ;;  %v1888_v23 = vand.u32 2147483648, %v2887_v58  ;;  %v2981_v26 = vadd.f32 0.0001, %v1802_v49  ;;  %v1923_v15 = vmul.f32 %v2964_v46, %v2909_v31 }
 0x207   :  { %v1790_v34 = vsub.f32 %v1608_v59, %v2866_v51  ;;  %v2993_v6 = vmul.f32 2.0, %v2970_v16  ;;  %v1880_v49 = vmul.f32 %v2932_v13, %v1879_v33  ;;  %v2999_v51 = vmul.f32 %v1867_v53, %v1851_v38 }
 0x208   :  { %v1862_v3 = vadd.f32 0.0009, %v1854_v37  ;;  %v3004_v41 = vor.u32 1.1754944e-38, %v1888_v23  ;;  %v1924_v28 = vsub.f32 1.0, %v1923_v15  ;;  %v145_v33 = vsel %vm123_vm0, %v2901_v19, 0.0  ;;  %v2186_v19 = vld [vmem:[%s3215_s1 + $0x78] sm:$0xff] }
 0x209   :  { %3219 = vst [vmem:[#allocation3_spill] sm:$0xff] %v2993_v6  ;;  %v1814_v62 = vmul.f32 2.0, %v1790_v34  ;;  %v1931_v53 = vand.u32 2147483647, %v2909_v31  ;;  %v146_v23 = vadd.f32 %v145_v33, %v144_v18  ;;  %vm1928_vm4 = vweird.f32 %v2964_v46  ;;  %v2187_v15 = vld [vmem:[%s3214_s0 + $0x78] sm:$0xff] }
 0x20a   :  { %v2985_v24 = vmul.f32 %v1862_v3, %v1846_v44  ;;  %v1886_v44 = vand.u32 2147483647, %v2887_v58  ;;  %v1933_v3 = vand.u32 2147483648, %v2909_v31  ;;  %v3029_v34 = vsub.f32 %v2187_v15, %v2186_v19  ;;  %vm3081_vm10 = vmor %vm1927_vm3, %vm1928_vm4 }
 0x20b   :  { %v1378_v36 = vpop.f32.mrf.mxu3  ;;  %v1493_v37 = vpop.f32.mrf.mxu2  ;;  %v1925_v4 = vmul.f32 %v2964_v46, %v1924_v28  ;;  %vm3045_vm6 = vcmp.eq.f32.partialorder %v1931_v53, 8.507059e+37 }
 0x20c   :  { %2174 = vrcp.f32 %v2985_v24  ;;  %v1785_v59 = vsub.f32 %v1493_v37, %v2920_v61  ;;  %v3015_v61 = vadd.f32 %v2932_v13, %v1880_v49  ;;  %v3018_v63 = vor.u32 1.1754944e-38, %v1933_v3 }
 0x20d   :  { %2176 = vrcp.f32 %v2999_v51  ;;  %v1822_v37 = vadd.f32 0.0009, %v1814_v62  ;;  %v148_v49 = vadd.f32 %v147_v39, %v146_v23  ;;  %vm3037_vm5 = vcmp.eq.f32.partialorder %v1886_v44, 8.507059e+37 }
 0x20e   :  { %v1857_v54 = vadd.f32 %v1785_v59, %v1777_v11  ;;  %v1677_v18 = vpop.f32.mrf.mxu1  ;;  %v1780_v11 = vsub.f32 %v1378_v36, %v2927_v17  ;;  %v121_v62 = vmul.f32 %v2408_v2, %v2408_v2  ;;  %v122_v17 = vmul.f32 %v3029_v34, %v3029_v34 }
 0x20f   :  { %v1901_v44 = vand.u32 2147483647, %v2985_v24  ;;  %v1793_v39 = vsub.f32 %v1677_v18, %v2879_v40  ;;  %v1926_v19 = vadd.f32 %v2964_v46, %v1925_v4  ;;  %vm1897_vm9 = vweird.f32 %v2985_v24 }
 0x210   :  { %v1865_v27 = vadd.f32 0.0009, %v1857_v54  ;;  %v149_v54 = vsel %vm123_vm0, %v120_v12, 0.0 }
 0x211   :  { %vm1902_vm12 = vcmp.eq.f32.partialorder %v1901_v44, 8.507059e+37 }
 0x212   :  { %v2175_v38 = vpop.eup %2174  ;;  %v3035_v59 = vmul.f32 %v1865_v27, %v1849_v7  ;;  %v150_v7 = vadd.f32 %v149_v54, %v148_v49  ;;  %v1903_v27 = vand.u32 2147483648, %v2985_v24  ;;  %v153_v49 = vsel %vm123_vm0, %v122_v17, 0.0 }
 0x213   :  { %v1893_v3 = vmul.f32 %v2175_v38, %v2985_v24  ;;  %v1447_v33 = vpop.f32.mrf.mxu3  ;;  %v1562_v43 = vpop.f32.mrf.mxu2  ;;  %vm1898_vm8 = vweird.f32 %v2175_v38  ;;  %v1830_v54 = vmul.f32 %v1822_v37, %v2925_v1  ;;  %v1930_v1 = vsel %vm3081_vm10, %v2964_v46, %v1926_v19 }
 0x214   :  { %v1783_v28 = vsub.f32 %v1447_v33, %v2907_v57  ;;  %v1788_v23 = vsub.f32 %v1562_v43, %v2934_v47  ;;  %2178 = vrcp.f32 %v3035_v59  ;;  %v3224_v57 = vsub.f32 %v2881_v14, %v2905_v22  ;;  %v3067_v15 = vpop.eup %2176  ;;  %vm1899_vm11 = vmor %vm1897_vm9, %vm1898_vm8 }
 0x215   :  { %v1894_v36 = vsub.f32 1.0, %v1893_v3  ;;  %v1885_v14 = vsel %vm3062_vm7, %v2932_v13, %v3015_v61  ;;  %v151_v22 = vsel %vm123_vm0, %v121_v62, 0.0  ;;  %v1817_v3 = vmul.f32 2.0, %v1793_v39 }
 0x216   :  { %v1855_v47 = vadd.f32 %v1783_v28, %v3224_v57  ;;  %v1860_v43 = vadd.f32 %v1788_v23, %v1780_v11  ;;  %v152_v13 = vadd.f32 %v151_v22, %v150_v7  ;;  %v1904_v24 = vor.u32 1.1754944e-38, %v1903_v27 }
 0x217   :  { %v1895_v40 = vmul.f32 %v2175_v38, %v1894_v36  ;;  %v200_v23 = vadd.f32 %v2897_v48, %v2353_v45  ;;  %v3101_v46 = vsel %vm3037_vm5, %v3004_v41, %v1885_v14  ;;  %v3109_v45 = vsel %vm3045_vm6, %v3018_v63, %v1930_v1 }
 0x218   :  { %v1863_v58 = vadd.f32 0.0009, %v1855_v47  ;;  %v1868_v18 = vadd.f32 0.0009, %v1860_v43  ;;  %v154_v28 = vadd.f32 %v153_v49, %v152_v13  ;;  %v1946_v44 = vand.u32 2147483647, %v3035_v59 }
 0x219   :  { %v1896_v4 = vadd.f32 %v2175_v38, %v1895_v40  ;;  %v1948_v39 = vand.u32 2147483648, %v3035_v59  ;;  %v3115_v41 = vmul.f32 %v3067_v15, %v2999_v51  ;;  %v3230_v63 = vand.u32 2147483647, %v2381_v55 }
 0x21a   :  { %v3086_v61 = vmul.f32 %v1863_v58, %v2957_v30  ;;  %v2179_v37 = vpop.eup %2178  ;;  %v3092_v62 = vmul.f32 %v1868_v18, %v2976_v25  ;;  %v1825_v25 = vadd.f32 0.0009, %v1817_v3  ;;  %155 = vadd.xlane.f32.xlu0 %v154_v28  ;;  %v177_v47 = vand.u32 2147483647, %v2419_v8 }
 0x21b   :  { %v1900_v33 = vsel %vm1899_vm11, %v2175_v38, %v1896_v4  ;;  %v1516_v31 = vpop.f32.mrf.mxu3  ;;  %v1938_v7 = vmul.f32 %v2179_v37, %v3035_v59  ;;  %v1631_v30 = vpop.f32.mrf.mxu2  ;;  %v201_v27 = vsel %vm123_vm0, %v3230_v63, 0.0  ;;  %vm1943_vm13 = vweird.f32 %v2179_v37 }
 0x21c   :  { %v1905_v17 = vsel %vm1902_vm12, %v1904_v24, %v1900_v33  ;;  %2180 = vrcp.f32 %v3086_v61  ;;  %v1786_v36 = vsub.f32 %v1516_v31, %v2948_v56  ;;  %v3229_v56 = vsub.f32 %v2883_v10, %v2918_v50 }
 0x21d   :  { %v3103_v38 = vmul.f32 %v1905_v17, %v1830_v54  ;;  %v1939_v48 = vsub.f32 1.0, %v1938_v7  ;;  %2182 = vrcp.f32 %v3092_v62  ;;  %v1791_v12 = vsub.f32 %v1631_v30, %v2875_v9 }
 0x21e   :  { %v1858_v6 = vadd.f32 %v1786_v36, %v3229_v56  ;;  %v202_v43 = vadd.f32 %v201_v27, %v200_v23  ;;  %v1833_v53 = vmul.f32 %v1825_v25, %v2959_v35  ;;  %vm1942_vm15 = vweird.f32 %v3035_v59 }
 0x21f   :  { %v1940_v57 = vmul.f32 %v2179_v37, %v1939_v48  ;;  %v3231_v10 = vand.u32 2147483647, %v2396_v60  ;;  %vm1947_vm1 = vcmp.eq.f32.partialorder %v1946_v44, 8.507059e+37  ;;  %v178_v55 = vand.u32 2147483647, %v2408_v2  ;;  %vm1944_vm2 = vmor %vm1942_vm15, %vm1943_vm13 }
 0x220   :  { %v1866_v19 = vadd.f32 0.0009, %v1858_v6  ;;  %v1949_v22 = vor.u32 1.1754944e-38, %v1948_v39  ;;  %v1815_v35 = vmul.f32 2.0, %v1791_v12  ;;  %v179_v49 = vand.u32 2147483647, %v3029_v34 }
 0x221   :  { %v203_v50 = vsel %vm123_vm0, %v3231_v10, 0.0  ;;  %v1941_v40 = vadd.f32 %v2179_v37, %v1940_v57  ;;  %v205_v54 = vsel %vm123_vm0, %v177_v47, 0.0  ;;  %v1916_v11 = vand.u32 2147483647, %v3086_v61 }
 0x222   :  { %v2181_v9 = vpop.eup %2180  ;;  %v204_v14 = vadd.f32 %v203_v50, %v202_v43  ;;  %v3134_v58 = vmul.f32 %v1866_v19, %v2988_v42  ;;  %v1918_v42 = vand.u32 2147483648, %v3086_v61  ;;  %v1823_v34 = vadd.f32 0.0009, %v1815_v35 }
 0x223   :  { %v1908_v8 = vmul.f32 %v2181_v9, %v3086_v61  ;;  %v1585_v59 = vpop.f32.mrf.mxu3  ;;  %v1945_v18 = vsel %vm1944_vm2, %v2179_v37, %v1941_v40  ;;  %v3139_v4 = vpop.eup %2182  ;;  %vm1913_vm3 = vweird.f32 %v2181_v9  ;;  %v209_v23 = vsel %vm123_vm0, %v179_v49, 0.0 }
 0x224   :  { %v1789_v60 = vsub.f32 %v1585_v59, %v2873_v21  ;;  %v1950_v2 = vsel %vm1947_vm1, %v1949_v22, %v1945_v18  ;;  %2184 = vrcp.f32 %v3134_v58  ;;  %v1700_v1 = vpop.f32.mrf.mxu2  ;;  %v207_v21 = vsel %vm123_vm0, %v178_v55, 0.0  ;;  %v1746_v37 = vpop.f32.mrf.mxu1 }
 0x225   :  { %v1909_v3 = vsub.f32 1.0, %v1908_v8  ;;  %v3143_v13 = vmul.f32 %v1950_v2, %v1833_v53  ;;  %v206_v31 = vadd.f32 %v205_v54, %v204_v14  ;;  %v1969_v17 = vsub.f32 1.0, %v3115_v41 }
 0x226   :  { %v1813_v24 = vmul.f32 2.0, %v1789_v60  ;;  %v1983_v7 = vmul.f32 %v3139_v4, %v3092_v62  ;;  %vm1912_vm4 = vweird.f32 %v3086_v61  ;;  %v1794_v25 = vsub.f32 %v1700_v1, %v2942_v52 }
 0x227   :  { %v1910_v33 = vmul.f32 %v2181_v9, %v1909_v3  ;;  %v208_v36 = vadd.f32 %v207_v21, %v206_v31  ;;  %v1796_v48 = vsub.f32 %v1746_v37, %v2929_v29  ;;  %vm1914_vm5 = vmor %vm1912_vm4, %vm1913_vm3  ;;  %v1919_v44 = vor.u32 1.1754944e-38, %v1918_v42 }
 0x228   :  { %v1821_v28 = vadd.f32 0.0009, %v1813_v24  ;;  %v1984_v56 = vsub.f32 1.0, %v1983_v7  ;;  %v1831_v12 = vmul.f32 %v1823_v34, %v2955_v5  ;;  %vm1917_vm0 = vcmp.eq.f32.partialorder %v1916_v11, 8.507059e+37 }
 0x229   :  { %v1911_v30 = vadd.f32 %v2181_v9, %v1910_v33  ;;  %v210_v27 = vadd.f32 %v209_v23, %v208_v36  ;;  %v1999_v61 = vsel %vm1997_vm14, %v3103_v38, 0.0  ;;  %v1818_v43 = vmul.f32 2.0, %v1794_v25  ;;  %v3236_v33 = vld [vmem:[#allocation3_spill] sm:$0xff] }
 0x22a   :  { %v1829_v39 = vmul.f32 %v1821_v28, %v2946_v20  ;;  %v2185_v6 = vpop.eup %2184  ;;  %v1961_v20 = vand.u32 2147483647, %v3134_v58  ;;  %vm1972_vm6 = vweird.f32 %v2999_v51  ;;  %v1963_v10 = vand.u32 2147483648, %v3134_v58 }
 0x22b   :  { %v1915_v41 = vsel %vm1914_vm5, %v2181_v9, %v1911_v30  ;;  %v1654_v63 = vpop.f32.mrf.mxu3  ;;  %v1953_v52 = vmul.f32 %v2185_v6, %v3134_v58  ;;  %211 = vadd.xlane.f32.xlu0 %v210_v27  ;;  %v1985_v38 = vmul.f32 %v3139_v4, %v1984_v56  ;;  %v1970_v40 = vmul.f32 %v3067_v15, %v1969_v17 }
 0x22c   :  { %v1920_v57 = vsel %vm1917_vm0, %v1919_v44, %v1915_v41  ;;  %v1891_v29 = vmul.f32 %v3101_v46, %v1829_v39  ;;  %v1792_v53 = vsub.f32 %v1654_v63, %v2877_v0  ;;  %v1820_v55 = vmul.f32 2.0, %v1796_v48  ;;  %v3237_v48 = vld [vmem:[#allocation2_spill] sm:$0xff] }
 0x22d   :  { %v1921_v47 = vmul.f32 %v1920_v57, %v1831_v12  ;;  %v1954_v19 = vsub.f32 1.0, %v1953_v52  ;;  %vm1958_vm7 = vweird.f32 %v2185_v6  ;;  %vm1973_vm8 = vweird.f32 %v3067_v15 }
 0x22e   :  { %v1998_v5 = vsel %vm1997_vm14, %v1891_v29, 0.0  ;;  %v1816_v46 = vmul.f32 2.0, %v1792_v53  ;;  %v1826_v0 = vadd.f32 0.0009, %v1818_v43  ;;  %vm1957_vm9 = vweird.f32 %v3134_v58  ;;  %vm3192_vm1 = vmor %vm1972_vm6, %vm1973_vm8 }
 0x22f   :  { %v2001_v50 = vsel %vm1997_vm14, %v1921_v47, 0.0  ;;  %v2000_v9 = vadd.f32 %v1999_v61, %v1998_v5  ;;  %v1955_v14 = vmul.f32 %v2185_v6, %v1954_v19  ;;  %vm1962_vm10 = vcmp.eq.f32.partialorder %v1961_v20, 8.507059e+37  ;;  %vm1959_vm12 = vmor %vm1957_vm9, %vm1958_vm7 }
 0x230   :  { %v1824_v22 = vadd.f32 0.0009, %v1816_v46  ;;  %v1986_v59 = vadd.f32 %v3139_v4, %v1985_v38  ;;  %vm1988_vm11 = vweird.f32 %v3139_v4  ;;  %v1964_v18 = vor.u32 1.1754944e-38, %v1963_v10 }
 0x231   :  { %v2002_v8 = vadd.f32 %v2001_v50, %v2000_v9  ;;  %v1956_v35 = vadd.f32 %v2185_v6, %v1955_v14  ;;  %v1971_v54 = vadd.f32 %v3067_v15, %v1970_v40  ;;  %v1993_v2 = vand.u32 2147483648, %v3092_v62 }
 0x232   :  { %v1832_v60 = vmul.f32 %v1824_v22, %v2961_v32  ;;  %vm1987_vm13 = vweird.f32 %v3092_v62  ;;  %v1991_v11 = vand.u32 2147483647, %v3092_v62  ;;  %v1976_v1 = vand.u32 2147483647, %v2999_v51 }
 0x233   :  { %v1723_v49 = vpop.f32.mrf.mxu3  ;;  %v1960_v3 = vsel %vm1959_vm12, %v2185_v6, %v1956_v35  ;;  %v1978_v21 = vand.u32 2147483648, %v2999_v51  ;;  %vm3183_vm15 = vmor %vm1987_vm13, %vm1988_vm11  ;;  %v1828_v37 = vadd.f32 0.0009, %v1820_v55  ;;  %v1811_v31 = vadd.f32 0.0001, %v3236_v33 }
 0x234   :  { %v1795_v58 = vsub.f32 %v1723_v49, %v2970_v16  ;;  %v1965_v42 = vsel %vm1962_vm10, %v1964_v18, %v1960_v3  ;;  %v1936_v24 = vmul.f32 %v3109_v45, %v1832_v60  ;;  %v1834_v16 = vmul.f32 %v1826_v0, %v2981_v26 }
 0x235   :  { %v1990_v45 = vsel %vm3183_vm15, %v3139_v4, %v1986_v59  ;;  %v1975_v26 = vsel %vm3192_vm1, %v3067_v15, %v1971_v54  ;;  %v1994_v23 = vor.u32 1.1754944e-38, %v1993_v2  ;;  %vm1992_vm2 = vcmp.eq.f32.partialorder %v1991_v11, 8.507059e+37 }
 0x236   :  { %v1819_v34 = vmul.f32 2.0, %v1795_v58  ;;  %v2003_v28 = vsel %vm1997_vm14, %v1936_v24, 0.0  ;;  %v1966_v17 = vmul.f32 %v1965_v42, %v1834_v16  ;;  %v1979_v30 = vor.u32 1.1754944e-38, %v1978_v21 }
 0x237   :  { %v2004_v51 = vadd.f32 %v2003_v28, %v2002_v8  ;;  %v1995_v25 = vsel %vm1992_vm2, %v1994_v23, %v1990_v45  ;;  %v2005_v36 = vsel %vm1997_vm14, %v3143_v13, 0.0  ;;  %v1836_v4 = vmul.f32 %v1828_v37, %v3237_v48 }
 0x238   :  { %v1827_v7 = vadd.f32 0.0009, %v1819_v34  ;;  %vm1977_vm3 = vcmp.eq.f32.partialorder %v1976_v1, 8.507059e+37  ;;  %v2007_v15 = vsel %vm1997_vm14, %v1966_v17, 0.0  ;;  %v2022_v59 = vlaneseq }
 0x239   :  { %v2006_v39 = vadd.f32 %v2005_v36, %v2004_v51  ;;  %v1980_v56 = vsel %vm1977_vm3, %v1979_v30, %v1975_v26  ;;  %v1996_v12 = vmul.f32 %v1995_v25, %v1836_v4 }
 0x23a   :  { %v1835_v44 = vmul.f32 %v1827_v7, %v1811_v31  ;;  %v2023_v18 = vshrl.u32 %v2022_v59, 7 }
 0x23b   :  { %v2008_v41 = vadd.f32 %v2007_v15, %v2006_v39  ;;  %v2011_v61 = vsel %vm1997_vm14, %v1996_v12, 0.0 }
 0x23c   :  { %v1981_v6 = vmul.f32 %v1980_v56, %v1835_v44  ;;  %vm2025_vm4 = vcmp.eq.s32.totalorder %v2023_v18, 1  ;;  %vm2024_vm5 = vcmp.eq.s32.totalorder %v2023_v18, 0 }
 0x23e   :  { %v2009_v63 = vsel %vm1997_vm14, %v1981_v6, 0.0  ;;  %vm2026_vm14 = vcmp.eq.s32.totalorder %v2023_v18, 2 }
 0x23f   :  { %v2010_v27 = vadd.f32 %v2009_v63, %v2008_v41 }
 0x241   :  { %v2012_v52 = vadd.f32 %v2011_v61, %v2010_v27 }
 0x243   :  { %2013 = vadd.xlane.f32.xlu1 %v2012_v52 }
 0x28d   :  { %v156_v57 = vpop.xlane.xlu0 %155 }
 0x28e   :  { %v157_v13 = vrot.slane %v156_v57, 4 }
 0x290   :  { %v158_v29 = vadd.f32 %v157_v13, %v156_v57 }
 0x292   :  { %v159_v47 = vrot.slane %v158_v29, 2 }
 0x294   :  { %v160_v43 = vadd.f32 %v159_v47, %v158_v29 }
 0x296   :  { %v161_v20 = vrot.slane %v160_v43, 1 }
 0x298   :  { %v162_v19 = vadd.f32 %v161_v20, %v160_v43 }
 0x29a   :  { %2164 = vpush %v162_v19 }
 0x29e   :  { %v212_v53 = vpop.xlane.xlu0 %211 }
 0x29f   :  { %v213_v5 = vrot.slane %v212_v53, 4 }
 0x2a1   :  { %v214_v10 = vadd.f32 %v213_v5, %v212_v53 }
 0x2a3   :  { %v215_v38 = vrot.slane %v214_v10, 2 }
 0x2a5   :  { %v216_v50 = vadd.f32 %v215_v38, %v214_v10 }
 0x2a7   :  { %v217_v9 = vrot.slane %v216_v50, 1 }
 0x2a9   :  { %v218_v46 = vadd.f32 %v217_v9, %v216_v50 }
 0x2ab   :  { %2166 = vpush %v218_v46 }
 0x2b6   :  { %v2014_v40 = vpop.xlane.xlu1 %2013 }
 0x2b7   :  { %v2015_v55 = vrot.slane %v2014_v40, 4 }
 0x2b9   :  { %v2016_v14 = vadd.f32 %v2015_v55, %v2014_v40 }
 0x2bb   :  { %v2017_v0 = vrot.slane %v2016_v14, 2 }
 0x2bd   :  { %v2018_v22 = vadd.f32 %v2017_v0, %v2016_v14 }
 0x2bf   :  { %v2019_v8 = vrot.slane %v2018_v22, 1 }
 0x2c1   :  { %v2020_v35 = vadd.f32 %v2019_v8, %v2018_v22 }
 0x2c3   :  { %2168 = vpush %v2020_v35 }
 0x2cb   :  { %s2165_s0 = spop %2164 }
 0x2cc   :  { %v2031_v2 = vstv %s2165_s0 }
 0x2dc   :  { %s2167_s1 = spop %2166 }
 0x2dd   :  { %v2029_v49 = vstv %s2167_s1 }
 0x2f4   :  { %s2169_s30 = spop %2168 }
 0x2f5   :  { %v2027_v60 = vstv %s2169_s30 }
 0x2f6   :  { %v2028_v54 = vsel %vm2026_vm14, %v2027_v60, 0.0 }
 0x2f7   :  { %v2030_v3 = vsel %vm2025_vm4, %v2029_v49, %v2028_v54 }
 0x2f8   :  { %v2032_v58 = vsel %vm2024_vm5, %v2031_v2, %v2030_v3 }
 0x2f9   :  { %2033 = vst [vmem:[%s3217_s4] sm:$0xff] %v2032_v58 }

</bundles_post_ra>
